<compile_context>
chip_gen: v6e
topology: v6e:2x2x1
jax: 0.10.0
libtpu: 0.0.40
codegen_flags: <defaults>
</compile_context>

<pallas_src>
import functools

import jax
import jax.numpy as jnp
from jax.experimental import pallas as pl
from jax.experimental.pallas import tpu as pltpu


def _pde_kernel(wp_ref, x_ref, out_ref, *, itr, ep, p, n_feat):
    N, F = out_ref.shape
    out_ref[...] = x_ref[...]

    # Loop-invariant lane masks (hoisted out of the iteration loop).
    lane = jax.lax.broadcasted_iota(jnp.int32, (N, F), 1)
    is_den = lane == 0              # ones column (fused Denominator)
    is_aux = lane == n_feat + 1     # spare zero lane used by the distance matmul
    expo = (p - 2.0) * 0.5          # static Python float

    def body(_, carry):
        x = out_ref[...]                                        # (N, F) f32
        if expo == 0.0:                                         # p == 2
            w = wp_ref[...]
        else:
            # Feature-only ||x_i||^2 (lane 0 holds an exact 1.0 -> subtract it).
            sq = jnp.sum(x * x, axis=1, keepdims=True) - 1.0    # (N, 1)
            # One MXU pass for all pairwise squared distances:
            #   A = [sq_i | x_i | 1 | 0..],  B = [1 | -2 x_j | sq_j | 0..]
            #   (A @ B^T)[i, j] = ||x_i||^2 + ||x_j||^2 - 2<x_i, x_j>
            a_mat = jnp.where(is_den, sq, jnp.where(is_aux, 1.0, x))
            b_mat = jnp.where(is_den, 1.0, jnp.where(is_aux, sq, -2.0 * x))
            diff2 = jax.lax.dot_general(
                a_mat, b_mat, (((1,), (1,)), ((), ())),
                preferred_element_type=jnp.float32)             # (N, N) f32
            diff2 = jnp.maximum(diff2, 0.0) + ep
            # Specialize the static exponent (p - 2) / 2.
            if expo == -0.5:                                    # p == 1
                tmp = jax.lax.rsqrt(diff2)
            elif expo == 0.5:                                   # p == 3
                tmp = jnp.sqrt(diff2)
            elif expo == 1.0:                                   # p == 4
                tmp = diff2
            else:                                               # generic
                tmp = jnp.power(diff2, expo)
            w = wp_ref[...] * tmp                               # (N, N)

        # num = w @ x on the MXU (bf16 operands, f32 accumulation).  Lane 0 of
        # x is 1.0, so num[:, 0] is the Denominator -> no cross-lane sum(w).
        num = jnp.dot(w.astype(jnp.bfloat16), x.astype(jnp.bfloat16),
                      preferred_element_type=jnp.float32)       # (N, F)
        # NOTE: a node with no incoming edge gives den == 0 -> Inf/NaN, exactly
        # like the PyTorch reference; no guard added to keep semantics equal.
        inv_den = pl.reciprocal(num[:, 0:1], approx=True)       # (N, 1)
        # Reset lane 0 to exactly 1.0 so the den fusion stays exact each iter.
        out_ref[...] = jnp.where(is_den, 1.0, num * inv_den)
        return carry

    # itr is a static Python int: fully unroll so the LLO scheduler can
    # interleave MXU / EUP / VMEM traffic across iterations.
    jax.lax.fori_loop(0, itr, body, 0, unroll=True)


def pde_forward(signal, src, tgt, edge_attr, *, itr, epsilon, p_val, f_pad=128):
    """Pallas implementation of PDE.forward(signal, itr)."""
    N, C = signal.shape
    assert f_pad >= C + 2, "need room for the ones column and one aux lane"

    # Dense target x source edge-weight matrix; .add matches scatter-sum if
    # duplicate edges exist.  sqrt(attr)^p == attr^(p/2) is iteration-invariant.
    wp = jnp.zeros((N, N), jnp.float32).at[tgt, src].add(
        jnp.power(edge_attr.astype(jnp.float32), p_val / 2.0))

    # lane 0 = 1.0 (fused Denominator column), lanes 1..C = features, rest 0.
    x_pad = jnp.zeros((N, f_pad), jnp.float32)
    x_pad = x_pad.at[:, 0].set(1.0)
    x_pad = x_pad.at[:, 1:1 + C].set(signal.astype(jnp.float32))

    kernel = functools.partial(_pde_kernel, itr=int(itr), ep=float(epsilon),
                               p=float(p_val), n_feat=C)

    cost = pl.CostEstimate(
        flops=int(itr) * (4 * N * N * f_pad + 10 * N * N),
        transcendentals=int(itr) * (N * N + N),
        bytes_accessed=N * N * 4 + 2 * N * f_pad * 4,
    )

    out = pl.pallas_call(
        kernel,
        out_shape=jax.ShapeDtypeStruct((N, f_pad), jnp.float32),
        in_specs=[pl.BlockSpec(memory_space=pltpu.MemorySpace.VMEM),
                  pl.BlockSpec(memory_space=pltpu.MemorySpace.VMEM)],
        out_specs=pl.BlockSpec(memory_space=pltpu.MemorySpace.VMEM),
        cost_estimate=cost,
    )(wp, x_pad)
    return out[:, 1:1 + C]


def pde_reference(signal, src, tgt, edge_attr, *, itr, epsilon, p_val):
    """Pure-JAX emulation of the PyTorch MessagePassing semantics."""
    N, C = signal.shape
    x = signal.astype(jnp.float32)
    wconst = jnp.sqrt(edge_attr.astype(jnp.float32)) ** p_val            # (E,)
    for _ in range(itr):
        xi = x[tgt]                                                      # x_i
        xj = x[src]                                                      # x_j
        a = xj - xi
        b = jnp.sum(a * a, axis=1)                                       # ||a||^2
        tmp1 = jnp.power(b + epsilon, (p_val - 2.0) / 2.0)
        w = wconst * tmp1                                                # (E,)
        num = jax.ops.segment_sum(w[:, None] * xj, tgt, num_segments=N)
        den = jax.ops.segment_sum(
            jnp.broadcast_to(w[:, None], (w.shape[0], C)), tgt, num_segments=N)
        x = num / den
    return x


if __name__ == "__main__":
    key = jax.random.PRNGKey(0)
    k_sig, k_attr = jax.random.split(key)

    N, C = 128, 3  # nodes, feature channels (the module stacks 3 copies => C=3)
    signal = jax.random.uniform(k_sig, (N, C), jnp.float32)

    # Deterministic 8-neighbour ring graph: every node has incoming edges.
    offsets = jnp.array([-4, -3, -2, -1, 1, 2, 3, 4], jnp.int32)
    tgt = jnp.repeat(jnp.arange(N, dtype=jnp.int32), offsets.shape[0])
    src = (tgt + jnp.tile(offsets, N)) % N
    edge_attr = jax.random.uniform(k_attr, (tgt.shape[0],), jnp.float32,
                                   minval=0.5, maxval=1.5)

    kwargs = dict(itr=3, epsilon=1e-4, p_val=1.0)

    out = pde_forward(signal, src, tgt, edge_attr, **kwargs)
    out = jax.block_until_ready(out)

    ref = pde_reference(signal, src, tgt, edge_attr, **kwargs)
    assert bool(jnp.all(jnp.isfinite(out)))
    # 5e-3 tolerance: the num matmul uses bf16 operands and the divide is an
    # approximate reciprocal; both stay well inside this bound vs the f32 ref.
    assert bool(jnp.allclose(out, ref, rtol=5e-3, atol=5e-3)), (
        "max abs err = %g" % float(jnp.max(jnp.abs(out - ref))))

    print("KERNEL_OK")
</pallas_src>

<mosaic_0001>
module attributes {stable_mosaic.version = 11 : i64} {
  func.func @_pde_kernel(%arg0: memref<128x128xf32, #tpu.memory_space<vmem>>, %arg1: memref<128x128xf32, #tpu.memory_space<vmem>>, %arg2: memref<128x128xf32, #tpu.memory_space<vmem>>) attributes {dimension_semantics = [], scalar_prefetch = 0 : i64, scratch_operands = 0 : i64, tpu.core_type = #tpu.core_type<tc>} {
    %c0 = arith.constant 0 : index
    %c0_0 = arith.constant 0 : index
    %0 = vector.load %arg1[%c0, %c0_0] : memref<128x128xf32, #tpu.memory_space<vmem>>, vector<128x128xf32>
    %c0_1 = arith.constant 0 : index
    %c0_2 = arith.constant 0 : index
    %1 = vector.load %arg2[%c0_1, %c0_2] : memref<128x128xf32, #tpu.memory_space<vmem>>, vector<128x128xf32>
    tpu.vector_store %arg2[%c0_1, %c0_2], %0 {strides = array<i32>} : memref<128x128xf32, #tpu.memory_space<vmem>>, vector<128x128xf32>,
    %2 = tpu.iota {dimensions = array<i32: 1>} : vector<128x128xi32>
    %c0_i32 = arith.constant 0 : i32
    %3 = vector.broadcast %c0_i32 : i32 to vector<128x128xi32>
    %4 = arith.cmpi eq, %2, %3 : vector<128x128xi32>
    %c4_i32 = arith.constant 4 : i32
    %5 = vector.broadcast %c4_i32 : i32 to vector<128x128xi32>
    %6 = arith.cmpi eq, %2, %5 : vector<128x128xi32>
    %c0_i32_3 = arith.constant 0 : i32
    %c0_4 = arith.constant 0 : index
    %c0_5 = arith.constant 0 : index
    %7 = vector.load %arg2[%c0_4, %c0_5] : memref<128x128xf32, #tpu.memory_space<vmem>>, vector<128x128xf32>
    %8 = arith.mulf %7, %7 : vector<128x128xf32>
    %cst = arith.constant dense<0.000000e+00> : vector<128xf32>
    %9 = vector.multi_reduction <add>, %8, %cst [1] : vector<128x128xf32> to vector<128xf32>
    %10 = vector.shape_cast %9 : vector<128xf32> to vector<128x1xf32>
    %cst_6 = arith.constant 1.000000e+00 : f32
    %11 = vector.broadcast %cst_6 : f32 to vector<128x1xf32>
    %12 = arith.subf %10, %11 : vector<128x1xf32>
    %cst_7 = arith.constant 1.000000e+00 : f32
    %13 = vector.broadcast %cst_7 : f32 to vector<128x128xf32>
    %14 = arith.select %6, %13, %7 : vector<128x128xi1>, vector<128x128xf32>
    %15 = vector.shape_cast %12 : vector<128x1xf32> to vector<128x1xf32>
    %16 = vector.broadcast %15 : vector<128x1xf32> to vector<128x128xf32>
    %17 = arith.select %4, %16, %14 : vector<128x128xi1>, vector<128x128xf32>
    %cst_8 = arith.constant -2.000000e+00 : f32
    %18 = vector.broadcast %cst_8 : f32 to vector<128x128xf32>
    %19 = arith.mulf %18, %7 : vector<128x128xf32>
    %20 = vector.shape_cast %12 : vector<128x1xf32> to vector<128x1xf32>
    %21 = vector.broadcast %20 : vector<128x1xf32> to vector<128x128xf32>
    %22 = arith.select %6, %21, %19 : vector<128x128xi1>, vector<128x128xf32>
    %cst_9 = arith.constant 1.000000e+00 : f32
    %23 = vector.broadcast %cst_9 : f32 to vector<128x128xf32>
    %24 = arith.select %4, %23, %22 : vector<128x128xi1>, vector<128x128xf32>
    %cst_10 = arith.constant dense<0.000000e+00> : vector<128x128xf32>
    %25 = tpu.matmul %17, %24, %cst_10 {dimension_numbers = #tpu.dot_dimension_numbers<[1], [1], [0], [0], [0, 0, 1, 0], [], []>} : vector<128x128xf32>, vector<128x128xf32>, vector<128x128xf32> -> vector<128x128xf32>
    %cst_11 = arith.constant 0.000000e+00 : f32
    %26 = vector.broadcast %cst_11 : f32 to vector<128x128xf32>
    %27 = arith.maximumf %25, %26 : vector<128x128xf32>
    %cst_12 = arith.constant 9.99999974E-5 : f32
    %28 = vector.broadcast %cst_12 : f32 to vector<128x128xf32>
    %29 = arith.addf %27, %28 : vector<128x128xf32>
    %30 = math.rsqrt %29 : vector<128x128xf32>
    %c0_13 = arith.constant 0 : index
    %c0_14 = arith.constant 0 : index
    %31 = vector.load %arg0[%c0_13, %c0_14] : memref<128x128xf32, #tpu.memory_space<vmem>>, vector<128x128xf32>
    %32 = arith.mulf %31, %30 : vector<128x128xf32>
    %33 = arith.truncf %32 : vector<128x128xf32> to vector<128x128xbf16>
    %34 = arith.truncf %7 : vector<128x128xf32> to vector<128x128xbf16>
    %cst_15 = arith.constant dense<0.000000e+00> : vector<128x128xf32>
    %35 = tpu.matmul %33, %34, %cst_15 {dimension_numbers = #tpu.dot_dimension_numbers<[1], [0], [0], [1], [0, 0, 1, 1], [], []>} : vector<128x128xbf16>, vector<128x128xbf16>, vector<128x128xf32> -> vector<128x128xf32>
    %36 = vector.extract_strided_slice %35 {offsets = [0, 0], sizes = [128, 1], strides = [1, 1]} : vector<128x128xf32> to vector<128x1xf32>
    %37 = tpu.reciprocal %36 {approx = true} : vector<128x1xf32> -> vector<128x1xf32>
    %38 = vector.broadcast %37 : vector<128x1xf32> to vector<128x128xf32>
    %39 = arith.mulf %35, %38 : vector<128x128xf32>
    %cst_16 = arith.constant 1.000000e+00 : f32
    %40 = vector.broadcast %cst_16 : f32 to vector<128x128xf32>
    %41 = arith.select %4, %40, %39 : vector<128x128xi1>, vector<128x128xf32>
    %c0_17 = arith.constant 0 : index
    %c0_18 = arith.constant 0 : index
    %42 = vector.load %arg2[%c0_17, %c0_18] : memref<128x128xf32, #tpu.memory_space<vmem>>, vector<128x128xf32>
    tpu.vector_store %arg2[%c0_17, %c0_18], %41 {strides = array<i32>} : memref<128x128xf32, #tpu.memory_space<vmem>>, vector<128x128xf32>,
    %c1_i32 = arith.constant 1 : i32
    %c0_19 = arith.constant 0 : index
    %c0_20 = arith.constant 0 : index
    %43 = vector.load %arg2[%c0_19, %c0_20] : memref<128x128xf32, #tpu.memory_space<vmem>>, vector<128x128xf32>
    %44 = arith.mulf %43, %43 : vector<128x128xf32>
    %cst_21 = arith.constant dense<0.000000e+00> : vector<128xf32>
    %45 = vector.multi_reduction <add>, %44, %cst_21 [1] : vector<128x128xf32> to vector<128xf32>
    %46 = vector.shape_cast %45 : vector<128xf32> to vector<128x1xf32>
    %cst_22 = arith.constant 1.000000e+00 : f32
    %47 = vector.broadcast %cst_22 : f32 to vector<128x1xf32>
    %48 = arith.subf %46, %47 : vector<128x1xf32>
    %cst_23 = arith.constant 1.000000e+00 : f32
    %49 = vector.broadcast %cst_23 : f32 to vector<128x128xf32>
    %50 = arith.select %6, %49, %43 : vector<128x128xi1>, vector<128x128xf32>
    %51 = vector.shape_cast %48 : vector<128x1xf32> to vector<128x1xf32>
    %52 = vector.broadcast %51 : vector<128x1xf32> to vector<128x128xf32>
    %53 = arith.select %4, %52, %50 : vector<128x128xi1>, vector<128x128xf32>
    %cst_24 = arith.constant -2.000000e+00 : f32
    %54 = vector.broadcast %cst_24 : f32 to vector<128x128xf32>
    %55 = arith.mulf %54, %43 : vector<128x128xf32>
    %56 = vector.shape_cast %48 : vector<128x1xf32> to vector<128x1xf32>
    %57 = vector.broadcast %56 : vector<128x1xf32> to vector<128x128xf32>
    %58 = arith.select %6, %57, %55 : vector<128x128xi1>, vector<128x128xf32>
    %cst_25 = arith.constant 1.000000e+00 : f32
    %59 = vector.broadcast %cst_25 : f32 to vector<128x128xf32>
    %60 = arith.select %4, %59, %58 : vector<128x128xi1>, vector<128x128xf32>
    %cst_26 = arith.constant dense<0.000000e+00> : vector<128x128xf32>
    %61 = tpu.matmul %53, %60, %cst_26 {dimension_numbers = #tpu.dot_dimension_numbers<[1], [1], [0], [0], [0, 0, 1, 0], [], []>} : vector<128x128xf32>, vector<128x128xf32>, vector<128x128xf32> -> vector<128x128xf32>
    %cst_27 = arith.constant 0.000000e+00 : f32
    %62 = vector.broadcast %cst_27 : f32 to vector<128x128xf32>
    %63 = arith.maximumf %61, %62 : vector<128x128xf32>
    %cst_28 = arith.constant 9.99999974E-5 : f32
    %64 = vector.broadcast %cst_28 : f32 to vector<128x128xf32>
    %65 = arith.addf %63, %64 : vector<128x128xf32>
    %66 = math.rsqrt %65 : vector<128x128xf32>
    %c0_29 = arith.constant 0 : index
    %c0_30 = arith.constant 0 : index
    %67 = vector.load %arg0[%c0_29, %c0_30] : memref<128x128xf32, #tpu.memory_space<vmem>>, vector<128x128xf32>
    %68 = arith.mulf %67, %66 : vector<128x128xf32>
    %69 = arith.truncf %68 : vector<128x128xf32> to vector<128x128xbf16>
    %70 = arith.truncf %43 : vector<128x128xf32> to vector<128x128xbf16>
    %cst_31 = arith.constant dense<0.000000e+00> : vector<128x128xf32>
    %71 = tpu.matmul %69, %70, %cst_31 {dimension_numbers = #tpu.dot_dimension_numbers<[1], [0], [0], [1], [0, 0, 1, 1], [], []>} : vector<128x128xbf16>, vector<128x128xbf16>, vector<128x128xf32> -> vector<128x128xf32>
    %72 = vector.extract_strided_slice %71 {offsets = [0, 0], sizes = [128, 1], strides = [1, 1]} : vector<128x128xf32> to vector<128x1xf32>
    %73 = tpu.reciprocal %72 {approx = true} : vector<128x1xf32> -> vector<128x1xf32>
    %74 = vector.broadcast %73 : vector<128x1xf32> to vector<128x128xf32>
    %75 = arith.mulf %71, %74 : vector<128x128xf32>
    %cst_32 = arith.constant 1.000000e+00 : f32
    %76 = vector.broadcast %cst_32 : f32 to vector<128x128xf32>
    %77 = arith.select %4, %76, %75 : vector<128x128xi1>, vector<128x128xf32>
    %c0_33 = arith.constant 0 : index
    %c0_34 = arith.constant 0 : index
    %78 = vector.load %arg2[%c0_33, %c0_34] : memref<128x128xf32, #tpu.memory_space<vmem>>, vector<128x128xf32>
    tpu.vector_store %arg2[%c0_33, %c0_34], %77 {strides = array<i32>} : memref<128x128xf32, #tpu.memory_space<vmem>>, vector<128x128xf32>,
    %c2_i32 = arith.constant 2 : i32
    %c0_35 = arith.constant 0 : index
    %c0_36 = arith.constant 0 : index
    %79 = vector.load %arg2[%c0_35, %c0_36] : memref<128x128xf32, #tpu.memory_space<vmem>>, vector<128x128xf32>
    %80 = arith.mulf %79, %79 : vector<128x128xf32>
    %cst_37 = arith.constant dense<0.000000e+00> : vector<128xf32>
    %81 = vector.multi_reduction <add>, %80, %cst_37 [1] : vector<128x128xf32> to vector<128xf32>
    %82 = vector.shape_cast %81 : vector<128xf32> to vector<128x1xf32>
    %cst_38 = arith.constant 1.000000e+00 : f32
    %83 = vector.broadcast %cst_38 : f32 to vector<128x1xf32>
    %84 = arith.subf %82, %83 : vector<128x1xf32>
    %cst_39 = arith.constant 1.000000e+00 : f32
    %85 = vector.broadcast %cst_39 : f32 to vector<128x128xf32>
    %86 = arith.select %6, %85, %79 : vector<128x128xi1>, vector<128x128xf32>
    %87 = vector.shape_cast %84 : vector<128x1xf32> to vector<128x1xf32>
    %88 = vector.broadcast %87 : vector<128x1xf32> to vector<128x128xf32>
    %89 = arith.select %4, %88, %86 : vector<128x128xi1>, vector<128x128xf32>
    %cst_40 = arith.constant -2.000000e+00 : f32
    %90 = vector.broadcast %cst_40 : f32 to vector<128x128xf32>
    %91 = arith.mulf %90, %79 : vector<128x128xf32>
    %92 = vector.shape_cast %84 : vector<128x1xf32> to vector<128x1xf32>
    %93 = vector.broadcast %92 : vector<128x1xf32> to vector<128x128xf32>
    %94 = arith.select %6, %93, %91 : vector<128x128xi1>, vector<128x128xf32>
    %cst_41 = arith.constant 1.000000e+00 : f32
    %95 = vector.broadcast %cst_41 : f32 to vector<128x128xf32>
    %96 = arith.select %4, %95, %94 : vector<128x128xi1>, vector<128x128xf32>
    %cst_42 = arith.constant dense<0.000000e+00> : vector<128x128xf32>
    %97 = tpu.matmul %89, %96, %cst_42 {dimension_numbers = #tpu.dot_dimension_numbers<[1], [1], [0], [0], [0, 0, 1, 0], [], []>} : vector<128x128xf32>, vector<128x128xf32>, vector<128x128xf32> -> vector<128x128xf32>
    %cst_43 = arith.constant 0.000000e+00 : f32
    %98 = vector.broadcast %cst_43 : f32 to vector<128x128xf32>
    %99 = arith.maximumf %97, %98 : vector<128x128xf32>
    %cst_44 = arith.constant 9.99999974E-5 : f32
    %100 = vector.broadcast %cst_44 : f32 to vector<128x128xf32>
    %101 = arith.addf %99, %100 : vector<128x128xf32>
    %102 = math.rsqrt %101 : vector<128x128xf32>
    %c0_45 = arith.constant 0 : index
    %c0_46 = arith.constant 0 : index
    %103 = vector.load %arg0[%c0_45, %c0_46] : memref<128x128xf32, #tpu.memory_space<vmem>>, vector<128x128xf32>
    %104 = arith.mulf %103, %102 : vector<128x128xf32>
    %105 = arith.truncf %104 : vector<128x128xf32> to vector<128x128xbf16>
    %106 = arith.truncf %79 : vector<128x128xf32> to vector<128x128xbf16>
    %cst_47 = arith.constant dense<0.000000e+00> : vector<128x128xf32>
    %107 = tpu.matmul %105, %106, %cst_47 {dimension_numbers = #tpu.dot_dimension_numbers<[1], [0], [0], [1], [0, 0, 1, 1], [], []>} : vector<128x128xbf16>, vector<128x128xbf16>, vector<128x128xf32> -> vector<128x128xf32>
    %108 = vector.extract_strided_slice %107 {offsets = [0, 0], sizes = [128, 1], strides = [1, 1]} : vector<128x128xf32> to vector<128x1xf32>
    %109 = tpu.reciprocal %108 {approx = true} : vector<128x1xf32> -> vector<128x1xf32>
    %110 = vector.broadcast %109 : vector<128x1xf32> to vector<128x128xf32>
    %111 = arith.mulf %107, %110 : vector<128x128xf32>
    %cst_48 = arith.constant 1.000000e+00 : f32
    %112 = vector.broadcast %cst_48 : f32 to vector<128x128xf32>
    %113 = arith.select %4, %112, %111 : vector<128x128xi1>, vector<128x128xf32>
    %c0_49 = arith.constant 0 : index
    %c0_50 = arith.constant 0 : index
    %114 = vector.load %arg2[%c0_49, %c0_50] : memref<128x128xf32, #tpu.memory_space<vmem>>, vector<128x128xf32>
    tpu.vector_store %arg2[%c0_49, %c0_50], %113 {strides = array<i32>} : memref<128x128xf32, #tpu.memory_space<vmem>>, vector<128x128xf32>,
    return
  }
}

</mosaic_0001>

<bundles_post_ra>
// kernel: tpu_custom_call.1
= control target key start
LH: loop header
LB: loop body
LE: loop exit
PB: predicated region body
PF: predicated region fallthrough
CT: control target
= control target key end

     0   :  { %7 = vsyncpa [#allocation3], 0  ;;  %s3942_s0 = inlined_call_operand.hbm [shape: f32[128,128], index: 0, kind: input, shape index: {}]   ;;  %s3943_s1 = inlined_call_operand.hbm [shape: f32[128,128], index: 1, kind: input, shape index: {}]   ;;  %s3944_s2 = inlined_call_operand.hbm [shape: f32[128,128], index: 2, kind: output, shape index: {}]  }
   0x1   :  { %8 = vsyncpa [#allocation6], 0 }
   0x2   :  { %9 = vsyncpa [#allocation4], 0  ;;  %s2743_s9 = smov [#allocation2]  }
   0x3   :  { %s15_s10 = sshll.u32 %s2743_s9, 4  ;;  %s16_s10 = int_to_ptr.vmem [resolvable:$true] %s15_s10 }
   0x4   :  { %s2685_s11 = scalar_lea.vmem %s16_s10, 2048  ;;  %p2690_p1 = scmp.lt.s32.totalorder %s16_s10, %s16_s10 }
   0x5   :  { %p2686_p0 = scmp.ne.s32.totalorder %s16_s10, %s2685_s11  ;;  %p2691_p2 = scmp.lt.s32.totalorder %s2685_s11, %s2685_s11 }
   0x7   :  { %p2692_p3 = por %p2691_p2, %p2690_p1 }
   0x9   :  { %p2693_p4 = pnand %p2692_p3, %p2686_p0 }
   0xb   :  { %2696 = shalt.err (!%p2693_p4)
}
   0xc   :  { %s2744_s12 = smov 128   ;;  %s2745_s13 = smov 8  }
   0xd   :  { %21 = dma.hbm_to_vmem [thread:$0]  %s3942_s0, 2048, %s16_s10, [#allocation3], %s2744_s12, %s2744_s12, %s2745_s13  }
   0xe   :  { %s2746_s16 = smov [#allocation5]  }
   0xf   :  { %s27_s17 = sshll.u32 %s2746_s16, 4  ;;  %s28_s17 = int_to_ptr.vmem [resolvable:$true] %s27_s17 }
  0x10   :  { %s2705_s18 = scalar_lea.vmem %s28_s17, 2048  ;;  %p2710_p6 = scmp.lt.s32.totalorder %s28_s17, %s28_s17 }
  0x11   :  { %p2706_p5 = scmp.ne.s32.totalorder %s28_s17, %s2705_s18  ;;  %p2711_p7 = scmp.lt.s32.totalorder %s2705_s18, %s2705_s18 }
  0x13   :  { %p2712_p8 = por %p2711_p7, %p2710_p6 }
  0x15   :  { %p2713_p9 = pnand %p2712_p8, %p2706_p5 }
  0x17   :  { %2716 = shalt.err (!%p2713_p9)
}
  0x18   :  { %33 = dma.hbm_to_vmem [thread:$0]  %s3943_s1, 2048, %s28_s17, [#allocation6], %s2744_s12, %s2744_s12, %s2745_s13  }
  0x19   :  { %2737 = dma.done.wait [#allocation3], 2048  }
  0x1a   :  { %2738 = vsyncadd [#allocation3], 4294965248 }
  0x1b   :  { %2739 = dma.done.wait [#allocation6], 2048  }
  0x1c   :  { %2740 = vsyncadd [#allocation6], 4294965248  ;;  %v2776_v0 = vld [vmem:[#allocation5 + $0x78] sm:$0xff]  ;;  %v2778_v1 = vld [vmem:[#allocation5 + $0x70] sm:$0xff]  ;;  %v73_v33 = vlaneseq  ;;  %s2748_s0 = smov [#allocation7]  }
  0x1d   :  { %v2780_v2 = vld [vmem:[#allocation5 + $0x68] sm:$0xff]  ;;  %v108_v3 = vmul.f32 %v2776_v0, %v2776_v0  ;;  %v2786_v5 = vld [vmem:[#allocation5 + $0x60] sm:$0xff]  ;;  %v107_v6 = vmul.f32 %v2778_v1, %v2778_v1  ;;  %v2792_v8 = vld [vmem:[#allocation5 + $0x58] sm:$0xff]  ;;  %v477_v32 = vpack.c.bf16 %v2776_v0, %v2778_v1  ;;  %v204_v35 = vmul.f32 -2.0, %v2776_v0  ;;  %s2008_s1 = sshll.u32 %s2748_s0, 4  ;;  %s2009_s1 = int_to_ptr.vmem [resolvable:$true] %s2008_s1 }
  0x1e   :  { %v106_v4 = vmul.f32 %v2780_v2, %v2780_v2  ;;  %v105_v7 = vmul.f32 %v2786_v5, %v2786_v5  ;;  %v2794_v9 = vld [vmem:[#allocation5 + $0x50] sm:$0xff]  ;;  %v104_v10 = vmul.f32 %v2792_v8, %v2792_v8  ;;  %v2800_v12 = vld [vmem:[#allocation5 + $0x48] sm:$0xff]  ;;  %v2802_v13 = vld [vmem:[#allocation5 + $0x40] sm:$0xff]  ;;  %v2842_v34 = vand.u32 127, %v73_v33  ;;  %s2717_s21 = scalar_lea.vmem %s2009_s1, 2048  ;;  %p2722_p11 = scmp.lt.s32.totalorder %s2009_s1, %s2009_s1 }
  0x1f   :  { %139 = vadd.xlane.f32.xlu0 %v108_v3  ;;  %v103_v11 = vmul.f32 %v2794_v9, %v2794_v9  ;;  %v102_v14 = vmul.f32 %v2800_v12, %v2800_v12  ;;  %v101_v15 = vmul.f32 %v2802_v13, %v2802_v13  ;;  %v2808_v16 = vld [vmem:[#allocation5 + $0x38] sm:$0xff]  ;;  %v2810_v17 = vld [vmem:[#allocation5 + $0x30] sm:$0xff]  ;;  %v2816_v20 = vld [vmem:[#allocation5 + $0x28] sm:$0xff]  ;;  %2269 = vmatprep.subr.bf16.mxu1 %v477_v32  ;;  %v202_v40 = vmul.f32 -2.0, %v2780_v2  ;;  %p2718_p10 = scmp.ne.s32.totalorder %s2009_s1, %s2717_s21  ;;  %p2723_p12 = scmp.lt.s32.totalorder %s2717_s21, %s2717_s21 }
  0x20   :  { %135 = vadd.xlane.f32.xlu1 %v106_v4  ;;  %v100_v18 = vmul.f32 %v2808_v16, %v2808_v16  ;;  %v99_v19 = vmul.f32 %v2810_v17, %v2810_v17  ;;  %v2818_v21 = vld [vmem:[#allocation5 + $0x20] sm:$0xff]  ;;  %v98_v22 = vmul.f32 %v2816_v20, %v2816_v20  ;;  %v2824_v24 = vld [vmem:[#allocation5 + $0x18] sm:$0xff]  ;;  %v2826_v25 = vld [vmem:[#allocation5 + $0x10] sm:$0xff]  ;;  %2270 = vmatpush3.bf16.msra.mxu1 %v477_v32  ;;  %vm76_vm0 = vcmp.eq.s32.totalorder %v2842_v34, 4 }
  0x21   :  { %v97_v23 = vmul.f32 %v2818_v21, %v2818_v21  ;;  %v96_v26 = vmul.f32 %v2824_v24, %v2824_v24  ;;  %v95_v27 = vmul.f32 %v2826_v25, %v2826_v25  ;;  %v2832_v28 = vld [vmem:[#allocation5 + $0x8] sm:$0xff]  ;;  %v2834_v29 = vld [vmem:[#allocation5] sm:$0xff]  ;;  %vm75_vm1 = vcmp.eq.s32.totalorder %v2842_v34, 0  ;;  %p2724_p13 = por %p2723_p12, %p2722_p11 }
  0x22   :  { %v94_v30 = vmul.f32 %v2832_v28, %v2832_v28  ;;  %v93_v31 = vmul.f32 %v2834_v29, %v2834_v29  ;;  %v203_v42 = vmul.f32 -2.0, %v2778_v1  ;;  %v201_v49 = vmul.f32 -2.0, %v2786_v5 }
  0x23   :  { %137 = vadd.xlane.f32.xlu0 %v107_v6  ;;  %v200_v57 = vmul.f32 -2.0, %v2792_v8  ;;  %v199_v62 = vmul.f32 -2.0, %v2794_v9  ;;  %p2725_p0 = pnand %p2724_p13, %p2718_p10 }
  0x24   :  { %133 = vadd.xlane.f32.xlu1 %v105_v7 }
  0x27   :  { %131 = vadd.xlane.f32.xlu0 %v104_v10  ;;  %v198_v10 = vmul.f32 -2.0, %v2800_v12 }
  0x28   :  { %129 = vadd.xlane.f32.xlu1 %v103_v11 }
  0x2b   :  { %127 = vadd.xlane.f32.xlu0 %v102_v14 }
  0x2c   :  { %125 = vadd.xlane.f32.xlu1 %v101_v15 }
  0x2f   :  { %123 = vadd.xlane.f32.xlu0 %v100_v18 }
  0x30   :  { %121 = vadd.xlane.f32.xlu1 %v99_v19  ;;  %v197_v19 = vmul.f32 -2.0, %v2802_v13 }
  0x33   :  { %119 = vadd.xlane.f32.xlu0 %v98_v22 }
  0x34   :  { %117 = vadd.xlane.f32.xlu1 %v97_v23 }
  0x37   :  { %115 = vadd.xlane.f32.xlu0 %v96_v26 }
  0x38   :  { %113 = vadd.xlane.f32.xlu1 %v95_v27 }
  0x3b   :  { %111 = vadd.xlane.f32.xlu0 %v94_v30 }
  0x3c   :  { %109 = vadd.xlane.f32.xlu1 %v93_v31  ;;  %v196_v31 = vmul.f32 -2.0, %v2808_v16 }
  0xa8   :  { %v140_v36 = vpop.xlane.xlu0 %139 }
  0xa9   :  { %v136_v37 = vpop.xlane.xlu1 %135  ;;  %v2846_v38 = vadd.f32 -1.0, %v140_v36 }
  0xaa   :  { %v2849_v39 = vadd.f32 -1.0, %v136_v37 }
  0xab   :  { %v220_v41 = vsel %vm76_vm0, %v2846_v38, %v204_v35  ;;  %v157_v35 = vsel %vm76_vm0, 1.0, %v2834_v29 }
  0xac   :  { %v138_v43 = vpop.xlane.xlu0 %137  ;;  %v236_v44 = vsel %vm75_vm1, 1.0, %v220_v41  ;;  %v218_v48 = vsel %vm76_vm0, %v2849_v39, %v202_v40  ;;  %v195_v40 = vmul.f32 -2.0, %v2810_v17 }
  0xad   :  { %v134_v45 = vpop.xlane.xlu1 %133  ;;  %v2858_v46 = vadd.f32 -1.0, %v138_v43  ;;  %2213 = vmatprep.subr.mxu0 %v236_v44  ;;  %v234_v52 = vsel %vm75_vm1, 1.0, %v218_v48 }
  0xae   :  { %v2860_v47 = vadd.f32 -1.0, %v134_v45  ;;  %2214 = vmatpush3.xpose.msra.mxu0 %v236_v44 }
  0xaf   :  { %v219_v50 = vsel %vm76_vm0, %v2858_v46, %v203_v42 }
  0xb0   :  { %v235_v51 = vsel %vm75_vm1, 1.0, %v219_v50  ;;  %v132_v53 = vpop.xlane.xlu0 %131  ;;  %v217_v56 = vsel %vm76_vm0, %v2860_v47, %v201_v49  ;;  %v194_v49 = vmul.f32 -2.0, %v2816_v20 }
  0xb1   :  { %v130_v54 = vpop.xlane.xlu1 %129  ;;  %2215 = vmatprep.subr.mxu0 %v235_v51  ;;  %v2873_v55 = vadd.f32 -1.0, %v132_v53  ;;  %v233_v58 = vsel %vm75_vm1, 1.0, %v217_v56  ;;  %v193_v53 = vmul.f32 -2.0, %v2818_v21 }
  0xb2   :  { %2216 = vmatpush3.xpose.msra.mxu0 %v235_v51  ;;  %v2881_v60 = vadd.f32 -1.0, %v130_v54 }
  0xb3   :  { %2217 = vmatprep.subr.mxu0 %v234_v52  ;;  %v216_v61 = vsel %vm76_vm0, %v2873_v55, %v200_v57 }
  0xb4   :  { %v128_v63 = vpop.xlane.xlu0 %127  ;;  %v232_v3 = vsel %vm75_vm1, 1.0, %v216_v61  ;;  %v215_v7 = vsel %vm76_vm0, %v2881_v60, %v199_v62 }
  0xb5   :  { %v126_v59 = vpop.xlane.xlu1 %125  ;;  %v2889_v6 = vadd.f32 -1.0, %v128_v63  ;;  %v231_v11 = vsel %vm75_vm1, 1.0, %v215_v7 }
  0xb6   :  { %2218 = vmatpush3.xpose.msra.mxu0 %v234_v52  ;;  %v2897_v15 = vadd.f32 -1.0, %v126_v59  ;;  %v192_v59 = vmul.f32 -2.0, %v2824_v24 }
  0xb7   :  { %2219 = vmatprep.subr.mxu0 %v233_v58  ;;  %v214_v18 = vsel %vm76_vm0, %v2889_v6, %v198_v10 }
  0xb8   :  { %v124_v22 = vpop.xlane.xlu0 %123  ;;  %v230_v23 = vsel %vm75_vm1, 1.0, %v214_v18  ;;  %v213_v30 = vsel %vm76_vm0, %v2897_v15, %v197_v19 }
  0xb9   :  { %v122_v4 = vpop.xlane.xlu1 %121  ;;  %v2905_v27 = vadd.f32 -1.0, %v124_v22  ;;  %v229_v32 = vsel %vm75_vm1, 1.0, %v213_v30  ;;  %v189_v22 = vmul.f32 -2.0, %v2834_v29 }
  0xba   :  { %2220 = vmatpush3.xpose.msra.mxu0 %v233_v58  ;;  %v2916_v36 = vadd.f32 -1.0, %v122_v4 }
  0xbb   :  { %2221 = vmatprep.subr.mxu0 %v232_v3  ;;  %v212_v37 = vsel %vm76_vm0, %v2905_v27, %v196_v31  ;;  %v158_v31 = vsel %vm76_vm0, 1.0, %v2832_v28 }
  0xbc   :  { %v120_v42 = vpop.xlane.xlu0 %119  ;;  %v228_v44 = vsel %vm75_vm1, 1.0, %v212_v37  ;;  %v211_v48 = vsel %vm76_vm0, %v2916_v36, %v195_v40  ;;  %v160_v37 = vsel %vm76_vm0, 1.0, %v2824_v24  ;;  %v161_v40 = vsel %vm76_vm0, 1.0, %v2818_v21 }
  0xbd   :  { %v118_v14 = vpop.xlane.xlu1 %117  ;;  %v2026_v45 = vadd.f32 -1.0, %v120_v42  ;;  %v227_v50 = vsel %vm75_vm1, 1.0, %v211_v48 }
  0xbe   :  { %2222 = vmatpush3.xpose.msra.mxu0 %v232_v3  ;;  %v2025_v51 = vadd.f32 -1.0, %v118_v14  ;;  %v191_v3 = vmul.f32 -2.0, %v2826_v25  ;;  %v190_v14 = vmul.f32 -2.0, %v2832_v28 }
  0xbf   :  { %2223 = vmatprep.subr.mxu0 %v231_v11  ;;  %v210_v52 = vsel %vm76_vm0, %v2026_v45, %v194_v49 }
  0xc0   :  { %v116_v54 = vpop.xlane.xlu0 %115  ;;  %v226_v56 = vsel %vm75_vm1, 1.0, %v210_v52  ;;  %v209_v58 = vsel %vm76_vm0, %v2025_v51, %v193_v53  ;;  %v177_v42 = vsel %vm75_vm1, %v2025_v51, %v161_v40  ;;  %v165_v51 = vsel %vm76_vm0, 1.0, %v2802_v13 }
  0xc1   :  { %v114_v26 = vpop.xlane.xlu1 %113  ;;  %v2024_v57 = vadd.f32 -1.0, %v116_v54  ;;  %v225_v61 = vsel %vm75_vm1, 1.0, %v209_v58  ;;  %v167_v53 = vsel %vm76_vm0, 1.0, %v2794_v9  ;;  %v171_v58 = vsel %vm76_vm0, 1.0, %v2778_v1 }
  0xc2   :  { %2224 = vmatpush3.xpose.msra.mxu0 %v231_v11  ;;  %v2023_v62 = vadd.f32 -1.0, %v114_v26  ;;  %v476_v1 = vpack.c.bf16 %v2780_v2, %v2786_v5 }
  0xc3   :  { %2225 = vmatprep.subr.mxu0 %v230_v23  ;;  %v208_v63 = vsel %vm76_vm0, %v2024_v57, %v192_v59 }
  0xc4   :  { %v112_v4 = vpop.xlane.xlu0 %111  ;;  %v224_v7 = vsel %vm75_vm1, 1.0, %v208_v63  ;;  %v207_v11 = vsel %vm76_vm0, %v2023_v62, %v191_v3  ;;  %2271 = vmatprep.subr.bf16.mxu1 %v476_v1 }
  0xc5   :  { %v110_v33 = vpop.xlane.xlu1 %109  ;;  %v2022_v10 = vadd.f32 -1.0, %v112_v4  ;;  %v223_v18 = vsel %vm75_vm1, 1.0, %v207_v11  ;;  %2272 = vmatpush3.bf16.msra.mxu1 %v476_v1 }
  0xc6   :  { %v2021_v41 = vadd.f32 -1.0, %v110_v33  ;;  %2226 = vmatpush3.xpose.msra.mxu0 %v230_v23 }
  0xc7   :  { %2227 = vmatprep.subr.mxu0 %v229_v32  ;;  %v206_v19 = vsel %vm76_vm0, %v2022_v10, %v190_v14  ;;  %v174_v33 = vsel %vm75_vm1, %v2022_v10, %v158_v31  ;;  %v3060_v31 = vld [vmem:[#allocation2 + $0x8] sm:$0xff] }
  0xc8   :  { %v173_v43 = vsel %vm75_vm1, %v2021_v41, %v157_v35  ;;  %v222_v23 = vsel %vm75_vm1, 1.0, %v206_v19  ;;  %v205_v26 = vsel %vm76_vm0, %v2021_v41, %v189_v22  ;;  %v176_v41 = vsel %vm75_vm1, %v2024_v57, %v160_v37 }
  0xc9   :  { %2245 = vmatprep.mubr.f32.mxu0 %v173_v43  ;;  %v221_v30 = vsel %vm75_vm1, 1.0, %v205_v26  ;;  %v162_v43 = vsel %vm76_vm0, 1.0, %v2816_v20 }
  0xca   :  { %2228 = vmatpush3.xpose.msra.mxu0 %v229_v32  ;;  %v159_v32 = vsel %vm76_vm0, 1.0, %v2826_v25  ;;  %v178_v48 = vsel %vm75_vm1, %v2026_v45, %v162_v43  ;;  %v181_v45 = vsel %vm75_vm1, %v2897_v15, %v165_v51  ;;  %v168_v15 = vsel %vm76_vm0, 1.0, %v2792_v8 }
  0xcb   :  { %2229 = vmatprep.subr.mxu0 %v228_v44  ;;  %v175_v35 = vsel %vm75_vm1, %v2023_v62, %v159_v32  ;;  %v184_v57 = vsel %vm75_vm1, %v2873_v55, %v168_v15  ;;  %v187_v55 = vsel %vm75_vm1, %v2858_v46, %v171_v58  ;;  %v474_v46 = vpack.c.bf16 %v2800_v12, %v2802_v13  ;;  %v3072_v58 = vld [vmem:[#allocation2 + $0x28] sm:$0xff] }
  0xce   :  { %2230 = vmatpush3.xpose.msra.mxu0 %v228_v44  ;;  %v163_v44 = vsel %vm76_vm0, 1.0, %v2810_v17 }
  0xcf   :  { %2231 = vmatprep.subr.mxu0 %v227_v50  ;;  %v179_v49 = vsel %vm75_vm1, %v2916_v36, %v163_v44  ;;  %v166_v36 = vsel %vm76_vm0, 1.0, %v2800_v12 }
  0xd0   :  { %v182_v54 = vsel %vm75_vm1, %v2889_v6, %v166_v36 }
  0xd2   :  { %2232 = vmatpush3.xpose.msra.mxu0 %v227_v50  ;;  %v164_v50 = vsel %vm76_vm0, 1.0, %v2808_v16 }
  0xd3   :  { %2233 = vmatprep.subr.mxu0 %v226_v56  ;;  %v180_v52 = vsel %vm75_vm1, %v2905_v27, %v164_v50  ;;  %v183_v27 = vsel %vm75_vm1, %v2881_v60, %v167_v53  ;;  %v170_v60 = vsel %vm76_vm0, 1.0, %v2780_v2  ;;  %v472_v2 = vpack.c.bf16 %v2816_v20, %v2818_v21  ;;  %v3066_v50 = vld [vmem:[#allocation2 + $0x18] sm:$0xff] }
  0xd4   :  { %v186_v59 = vsel %vm75_vm1, %v2849_v39, %v170_v60  ;;  %v475_v39 = vpack.c.bf16 %v2792_v8, %v2794_v9  ;;  %v470_v8 = vpack.c.bf16 %v2832_v28, %v2834_v29 }
  0xd6   :  { %2234 = vmatpush3.xpose.msra.mxu0 %v226_v56  ;;  %v169_v56 = vsel %vm76_vm0, 1.0, %v2786_v5  ;;  %2273 = vmatprep.subr.bf16.mxu1 %v475_v39  ;;  %v471_v5 = vpack.c.bf16 %v2824_v24, %v2826_v25 }
  0xd7   :  { %2235 = vmatprep.subr.mxu0 %v225_v61  ;;  %v185_v6 = vsel %vm75_vm1, %v2860_v47, %v169_v56  ;;  %v172_v47 = vsel %vm76_vm0, 1.0, %v2776_v0  ;;  %2274 = vmatpush3.bf16.msra.mxu1 %v475_v39  ;;  %v473_v0 = vpack.c.bf16 %v2808_v16, %v2810_v17 }
  0xd8   :  { %2275 = vmatprep.subr.bf16.mxu1 %v474_v46 }
  0xda   :  { %2236 = vmatpush3.xpose.msra.mxu0 %v225_v61  ;;  %v188_v61 = vsel %vm75_vm1, %v2846_v38, %v172_v47  ;;  %v3074_v47 = vld [vmem:[#allocation2 + $0x20] sm:$0xff] }
  0xdb   :  { %2237 = vmatprep.subr.mxu0 %v224_v7  ;;  %2276 = vmatpush3.bf16.msra.mxu1 %v474_v46 }
  0xdc   :  { %2277 = vmatprep.subr.bf16.mxu1 %v473_v0 }
  0xde   :  { %2238 = vmatpush3.xpose.msra.mxu0 %v224_v7 }
  0xdf   :  { %2239 = vmatprep.subr.mxu0 %v223_v18  ;;  %2278 = vmatpush3.bf16.msra.mxu1 %v473_v0 }
  0xe0   :  { %2279 = vmatprep.subr.bf16.mxu1 %v472_v2 }
  0xe2   :  { %2240 = vmatpush3.xpose.msra.mxu0 %v223_v18 }
  0xe3   :  { %2241 = vmatprep.subr.mxu0 %v222_v23  ;;  %2280 = vmatpush3.bf16.msra.mxu1 %v472_v2 }
  0xe4   :  { %2281 = vmatprep.subr.bf16.mxu1 %v471_v5 }
  0xe6   :  { %2242 = vmatpush3.xpose.msra.mxu0 %v222_v23 }
  0xe7   :  { %2243 = vmatprep.subr.mxu0 %v221_v30  ;;  %2282 = vmatpush3.bf16.msra.mxu1 %v471_v5 }
  0xe8   :  { %2283 = vmatprep.subr.bf16.mxu1 %v470_v8 }
  0xea   :  { %2244 = vmatpush3.xpose.msra.mxu0 %v221_v30 }
  0xeb   :  { %2284 = vmatpush3.bf16.msra.mxu1 %v470_v8 }
  0xed   :  { %2246 = vmatmul.mubr.f32.vlgmr.msra.gmra.mxu0 %v174_v33 }
  0xee   :  { %2248 = vmatprep.mubr.f32.mxu0 %v175_v35  ;;  %v3062_v35 = vld [vmem:[#allocation2] sm:$0xff] }
  0xf1   :  { %2249 = vmatmul.mubr.f32.gmra.mxu0 %v176_v41 }
  0xf2   :  { %2251 = vmatprep.mubr.f32.mxu0 %v177_v42 }
  0xf5   :  { %2252 = vmatmul.mubr.f32.gmra.mxu0 %v178_v48 }
  0xf6   :  { %2254 = vmatprep.mubr.f32.mxu0 %v179_v49 }
  0xf9   :  { %2255 = vmatmul.mubr.f32.gmra.mxu0 %v180_v52 }
  0xfa   :  { %2257 = vmatprep.mubr.f32.mxu0 %v181_v45  ;;  %v3068_v45 = vld [vmem:[#allocation2 + $0x10] sm:$0xff] }
  0xfd   :  { %2258 = vmatmul.mubr.f32.gmra.mxu0 %v182_v54 }
  0xfe   :  { %2260 = vmatprep.mubr.f32.mxu0 %v183_v27 }
 0x101   :  { %2261 = vmatmul.mubr.f32.gmra.mxu0 %v184_v57 }
 0x102   :  { %2263 = vmatprep.mubr.f32.mxu0 %v185_v6 }
 0x105   :  { %2264 = vmatmul.mubr.f32.gmra.mxu0 %v186_v59 }
 0x106   :  { %2266 = vmatprep.mubr.f32.mxu0 %v187_v55 }
 0x109   :  { %2267 = vmatmul.mubr.f32.gmra.mxu0 %v188_v61 }
 0x1ad   :  { %v2247_v9 = vpop.f32.mrf.mxu0 }
 0x1ae   :  { %v383_v12 = vmax.f32 %v2247_v9, 0.0 }
 0x1af   :  { %v303_v13 = vpop.f32.mrf.mxu0 }
 0x1b0   :  { %v399_v16 = vadd.f32 0.0001, %v383_v12  ;;  %v382_v17 = vmax.f32 %v303_v13, 0.0 }
 0x1b1   :  { %v2250_v38 = vpop.f32.mrf.mxu0 }
 0x1b2   :  { %2485 = vrsqrt.f32 %v399_v16  ;;  %v398_v20 = vadd.f32 0.0001, %v382_v17  ;;  %v385_v21 = vmax.f32 %v2250_v38, 0.0  ;;  %v3078_v16 = vld [vmem:[#allocation2 + $0x30] sm:$0xff]  ;;  %v3080_v17 = vld [vmem:[#allocation2 + $0x38] sm:$0xff] }
 0x1b3   :  { %v313_v62 = vpop.f32.mrf.mxu0 }
 0x1b4   :  { %2487 = vrsqrt.f32 %v398_v20  ;;  %v401_v63 = vadd.f32 0.0001, %v385_v21  ;;  %v384_v24 = vmax.f32 %v313_v62, 0.0 }
 0x1b5   :  { %v2253_v25 = vpop.f32.mrf.mxu0 }
 0x1b6   :  { %2489 = vrsqrt.f32 %v401_v63  ;;  %v400_v3 = vadd.f32 0.0001, %v384_v24  ;;  %v387_v4 = vmax.f32 %v2253_v25, 0.0 }
 0x1b7   :  { %v323_v28 = vpop.f32.mrf.mxu0 }
 0x1b8   :  { %2491 = vrsqrt.f32 %v400_v3  ;;  %v403_v29 = vadd.f32 0.0001, %v387_v4  ;;  %v386_v7 = vmax.f32 %v323_v28, 0.0  ;;  %v3084_v4 = vld [vmem:[#allocation2 + $0x40] sm:$0xff]  ;;  %v3086_v28 = vld [vmem:[#allocation2 + $0x48] sm:$0xff] }
 0x1b9   :  { %v2256_v10 = vpop.f32.mrf.mxu0 }
 0x1ba   :  { %2493 = vrsqrt.f32 %v403_v29  ;;  %v402_v11 = vadd.f32 0.0001, %v386_v7  ;;  %v389_v14 = vmax.f32 %v2256_v10, 0.0 }
 0x1bb   :  { %v333_v18 = vpop.f32.mrf.mxu0 }
 0x1bc   :  { %2495 = vrsqrt.f32 %v402_v11  ;;  %v405_v19 = vadd.f32 0.0001, %v389_v14  ;;  %v388_v22 = vmax.f32 %v333_v18, 0.0  ;;  %v3090_v18 = vld [vmem:[#allocation2 + $0x50] sm:$0xff] }
 0x1bd   :  { %v2259_v23 = vpop.f32.mrf.mxu0 }
 0x1be   :  { %2497 = vrsqrt.f32 %v405_v19  ;;  %v404_v26 = vadd.f32 0.0001, %v388_v22  ;;  %v391_v30 = vmax.f32 %v2259_v23, 0.0  ;;  %v3092_v19 = vld [vmem:[#allocation2 + $0x58] sm:$0xff] }
 0x1bf   :  { %v2486_v32 = vpop.eup %2485  ;;  %v343_v33 = vpop.f32.mrf.mxu0 }
 0x1c0   :  { %2499 = vrsqrt.f32 %v404_v26  ;;  %v407_v37 = vadd.f32 0.0001, %v391_v30  ;;  %v390_v40 = vmax.f32 %v343_v33, 0.0  ;;  %v447_v43 = vmul.f32 %v2486_v32, %v3060_v31  ;;  %v3096_v33 = vld [vmem:[#allocation2 + $0x60] sm:$0xff] }
 0x1c1   :  { %v2488_v41 = vpop.eup %2487  ;;  %v2262_v42 = vpop.f32.mrf.mxu0 }
 0x1c2   :  { %2501 = vrsqrt.f32 %v407_v37  ;;  %v406_v44 = vadd.f32 0.0001, %v390_v40  ;;  %v393_v48 = vmax.f32 %v2262_v42, 0.0  ;;  %v446_v49 = vmul.f32 %v2488_v41, %v3062_v35  ;;  %v3098_v37 = vld [vmem:[#allocation2 + $0x68] sm:$0xff] }
 0x1c3   :  { %v2490_v51 = vpop.eup %2489  ;;  %v353_v52 = vpop.f32.mrf.mxu0 }
 0x1c4   :  { %2503 = vrsqrt.f32 %v406_v44  ;;  %v409_v36 = vadd.f32 0.0001, %v393_v48  ;;  %v392_v53 = vmax.f32 %v353_v52, 0.0  ;;  %v462_v54 = vpack.c.bf16 %v447_v43, %v446_v49  ;;  %v3102_v48 = vld [vmem:[#allocation2 + $0x70] sm:$0xff]  ;;  %v3104_v49 = vld [vmem:[#allocation2 + $0x78] sm:$0xff] }
 0x1c5   :  { %v2492_v27 = vpop.eup %2491  ;;  %v2265_v15 = vpop.f32.mrf.mxu0  ;;  %v449_v56 = vmul.f32 %v2490_v51, %v3066_v50 }
 0x1c6   :  { %2505 = vrsqrt.f32 %v409_v36  ;;  %v408_v57 = vadd.f32 0.0001, %v392_v53  ;;  %v395_v6 = vmax.f32 %v2265_v15, 0.0  ;;  %2285 = vmatprep.mubr.bf16.mxu1 %v462_v54  ;;  %v448_v60 = vmul.f32 %v2492_v27, %v3068_v45 }
 0x1c7   :  { %v2494_v59 = vpop.eup %2493  ;;  %v363_v55 = vpop.f32.mrf.mxu0  ;;  %v2747_v27 = vmov 0  }
 0x1c8   :  { %2507 = vrsqrt.f32 %v408_v57  ;;  %v411_v61 = vadd.f32 0.0001, %v395_v6  ;;  %v394_v1 = vmax.f32 %v363_v55, 0.0  ;;  %v463_v39 = vpack.c.bf16 %v449_v56, %v448_v60  ;;  %2484 = vset.pattern.permute.xlu1 %v2747_v27  ;;  %2483 = vset.pattern.permute.xlu0 %v2747_v27 }
 0x1c9   :  { %v2496_v46 = vpop.eup %2495  ;;  %v2268_v0 = vpop.f32.mrf.mxu0  ;;  %v451_v2 = vmul.f32 %v2494_v59, %v3072_v58 }
 0x1ca   :  { %2509 = vrsqrt.f32 %v411_v61  ;;  %v410_v5 = vadd.f32 0.0001, %v394_v1  ;;  %v397_v8 = vmax.f32 %v2268_v0, 0.0  ;;  %2286 = vmatmul.mubr.bf16.vlgmr.msra.gmra.mxu1 %v463_v39  ;;  %v450_v9 = vmul.f32 %v2496_v46, %v3074_v47 }
 0x1cb   :  { %v2498_v12 = vpop.eup %2497  ;;  %v373_v13 = vpop.f32.mrf.mxu0 }
 0x1cc   :  { %2511 = vrsqrt.f32 %v410_v5  ;;  %v413_v38 = vadd.f32 0.0001, %v397_v8  ;;  %v396_v20 = vmax.f32 %v373_v13, 0.0  ;;  %v464_v21 = vpack.c.bf16 %v451_v2, %v450_v9 }
 0x1cd   :  { %v2500_v62 = vpop.eup %2499  ;;  %v453_v25 = vmul.f32 %v2498_v12, %v3080_v17 }
 0x1ce   :  { %2513 = vrsqrt.f32 %v413_v38  ;;  %v412_v63 = vadd.f32 0.0001, %v396_v20  ;;  %2289 = vmatprep.mubr.bf16.mxu1 %v464_v21  ;;  %v452_v24 = vmul.f32 %v2500_v62, %v3078_v16 }
 0x1cf   :  { %v2502_v3 = vpop.eup %2501 }
 0x1d0   :  { %2515 = vrsqrt.f32 %v412_v63  ;;  %v465_v29 = vpack.c.bf16 %v453_v25, %v452_v24  ;;  %v455_v11 = vmul.f32 %v2502_v3, %v3086_v28 }
 0x1d1   :  { %v2504_v7 = vpop.eup %2503 }
 0x1d2   :  { %2290 = vmatmul.mubr.bf16.gmra.mxu1 %v465_v29  ;;  %v454_v10 = vmul.f32 %v2504_v7, %v3084_v4 }
 0x1d3   :  { %v2506_v14 = vpop.eup %2505 }
 0x1d4   :  { %v466_v22 = vpack.c.bf16 %v455_v11, %v454_v10  ;;  %v457_v30 = vmul.f32 %v2506_v14, %v3092_v19 }
 0x1d5   :  { %v2508_v23 = vpop.eup %2507 }
 0x1d6   :  { %2293 = vmatprep.mubr.bf16.mxu1 %v466_v22  ;;  %v456_v26 = vmul.f32 %v2508_v23, %v3090_v18 }
 0x1d7   :  { %v2510_v32 = vpop.eup %2509 }
 0x1d8   :  { %v467_v40 = vpack.c.bf16 %v457_v30, %v456_v26  ;;  %v459_v43 = vmul.f32 %v2510_v32, %v3098_v37 }
 0x1d9   :  { %v2512_v41 = vpop.eup %2511 }
 0x1da   :  { %2294 = vmatmul.mubr.bf16.gmra.mxu1 %v467_v40  ;;  %v458_v42 = vmul.f32 %v2512_v41, %v3096_v33 }
 0x1db   :  { %v2514_v44 = vpop.eup %2513 }
 0x1dc   :  { %v468_v51 = vpack.c.bf16 %v459_v43, %v458_v42  ;;  %v461_v53 = vmul.f32 %v2514_v44, %v3104_v49 }
 0x1dd   :  { %v2516_v52 = vpop.eup %2515 }
 0x1de   :  { %2297 = vmatprep.mubr.bf16.mxu1 %v468_v51  ;;  %v460_v36 = vmul.f32 %v2516_v52, %v3102_v48 }
 0x1e0   :  { %v469_v54 = vpack.c.bf16 %v461_v53, %v460_v36 }
 0x1e2   :  { %2298 = vmatmul.mubr.bf16.gmra.mxu1 %v469_v54 }
 0x28a   :  { %v3108_v15 = vpop.f32.mrf.mxu1 }
 0x28c   :  { %v3110_v56 = vpop.f32.mrf.mxu1 }
 0x28e   :  { %v3112_v57 = vpop.f32.mrf.mxu1 }
 0x290   :  { %v3114_v6 = vpop.f32.mrf.mxu1 }
 0x292   :  { %v3116_v60 = vpop.f32.mrf.mxu1 }
 0x294   :  { %v3118_v59 = vpop.f32.mrf.mxu1 }
 0x296   :  { %v3120_v55 = vpop.f32.mrf.mxu1 }
 0x298   :  { %v3122_v61 = vpop.f32.mrf.mxu1 }
 0x29a   :  { %v3124_v1 = vpop.f32.mrf.mxu1 }
 0x29c   :  { %v3126_v39 = vpop.f32.mrf.mxu1 }
 0x29e   :  { %v3128_v46 = vpop.f32.mrf.mxu1 }
 0x2a0   :  { %v3130_v0 = vpop.f32.mrf.mxu1 }
 0x2a2   :  { %v2299_v2 = vpop.f32.mrf.mxu1 }
 0x2a3   :  { %2517 = vrcp.f32 %v2299_v2 }
 0x2a4   :  { %v3132_v5 = vpop.f32.mrf.mxu1 }
 0x2a6   :  { %v2300_v8 = vpop.f32.mrf.mxu1 }
 0x2a7   :  { %2519 = vrcp.f32 %v2300_v8 }
 0x2a8   :  { %v563_v9 = vpop.f32.mrf.mxu1 }
 0x2a9   :  { %2521 = vrcp.f32 %v563_v9 }
 0x2aa   :  { %2523 = vrcp.f32 %v3116_v60 }
 0x2ab   :  { %2525 = vrcp.f32 %v3132_v5 }
 0x2ac   :  { %2527 = vrcp.f32 %v3118_v59 }
 0x2ad   :  { %2529 = vrcp.f32 %v3128_v46 }
 0x2ae   :  { %2531 = vrcp.f32 %v3108_v15 }
 0x2af   :  { %2533 = vrcp.f32 %v3124_v1 }
 0x2b0   :  { %v2518_v12 = vpop.eup %2517  ;;  %2535 = vrcp.f32 %v3110_v56 }
 0x2b1   :  { %663 = vperm.xlu1 %2484, %v2518_v12   ;;  %2537 = vrcp.f32 %v3130_v0 }
 0x2b2   :  { %2539 = vrcp.f32 %v3126_v39 }
 0x2b3   :  { %2541 = vrcp.f32 %v3120_v55 }
 0x2b4   :  { %v2520_v13 = vpop.eup %2519  ;;  %2543 = vrcp.f32 %v3122_v61 }
 0x2b5   :  { %668 = vperm.xlu0 %2483, %v2520_v13   ;;  %2545 = vrcp.f32 %v3112_v57 }
 0x2b6   :  { %v2522_v38 = vpop.eup %2521  ;;  %2547 = vrcp.f32 %v3114_v6 }
 0x2b7   :  { %658 = vperm.xlu1 %2484, %v2522_v38   ;;  %v2524_v20 = vpop.eup %2523 }
 0x2b8   :  { %v2526_v21 = vpop.eup %2525 }
 0x2b9   :  { %623 = vperm.xlu0 %2483, %v2524_v20   ;;  %v2528_v62 = vpop.eup %2527 }
 0x2ba   :  { %v2530_v63 = vpop.eup %2529 }
 0x2bb   :  { %653 = vperm.xlu1 %2484, %v2526_v21   ;;  %v2532_v24 = vpop.eup %2531 }
 0x2bc   :  { %v2534_v25 = vpop.eup %2533 }
 0x2bd   :  { %613 = vperm.xlu0 %2483, %v2528_v62   ;;  %v2536_v3 = vpop.eup %2535 }
 0x2be   :  { %v2538_v29 = vpop.eup %2537 }
 0x2bf   :  { %648 = vperm.xlu1 %2484, %v2530_v63   ;;  %v2540_v7 = vpop.eup %2539 }
 0x2c0   :  { %v2542_v10 = vpop.eup %2541 }
 0x2c1   :  { %603 = vperm.xlu0 %2483, %v2532_v24   ;;  %v2544_v11 = vpop.eup %2543 }
 0x2c2   :  { %v2546_v14 = vpop.eup %2545 }
 0x2c3   :  { %643 = vperm.xlu1 %2484, %v2534_v25   ;;  %v2548_v22 = vpop.eup %2547 }
 0x2c5   :  { %593 = vperm.xlu0 %2483, %v2536_v3  }
 0x2c7   :  { %638 = vperm.xlu1 %2484, %v2538_v29  }
 0x2cb   :  { %633 = vperm.xlu1 %2484, %v2540_v7  }
 0x2cf   :  { %628 = vperm.xlu1 %2484, %v2542_v10  }
 0x2d3   :  { %618 = vperm.xlu1 %2484, %v2544_v11  }
 0x2d7   :  { %608 = vperm.xlu1 %2484, %v2546_v14  }
 0x2db   :  { %598 = vperm.xlu1 %2484, %v2548_v22  }
 0x32c   :  { %v664_v23 = vpop.permute.xlu1 %663 }
 0x32d   :  { %v685_v26 = vmul.f32 %v2299_v2, %v664_v23 }
 0x32f   :  { %v3149_v30 = vsel %vm75_vm1, 1.0, %v685_v26 }
 0x330   :  { %v669_v32 = vpop.permute.xlu0 %668  ;;  %v749_v40 = vmul.f32 %v3149_v30, %v3149_v30 }
 0x331   :  { %v686_v41 = vmul.f32 %v2300_v8, %v669_v32 }
 0x332   :  { %v659_v42 = vpop.permute.xlu1 %658  ;;  %779 = vadd.xlane.f32.xlu0 %v749_v40 }
 0x333   :  { %v3155_v43 = vsel %vm75_vm1, 1.0, %v686_v41  ;;  %v684_v44 = vmul.f32 %v659_v42, %v563_v9 }
 0x334   :  { %v1119_v51 = vpack.c.bf16 %v3155_v43, %v3149_v30  ;;  %v750_v52 = vmul.f32 %v3155_v43, %v3155_v43  ;;  %v624_v38 = vpop.permute.xlu0 %623 }
 0x335   :  { %v3163_v36 = vsel %vm75_vm1, 1.0, %v684_v44  ;;  %v677_v11 = vmul.f32 %v3116_v60, %v624_v38 }
 0x336   :  { %v654_v53 = vpop.permute.xlu1 %653  ;;  %2357 = vmatprep.subr.bf16.mxu0 %v1119_v51  ;;  %781 = vadd.xlane.f32.xlu1 %v750_v52  ;;  %v748_v54 = vmul.f32 %v3163_v36, %v3163_v36 }
 0x337   :  { %v683_v27 = vmul.f32 %v654_v53, %v3132_v5  ;;  %2358 = vmatpush3.bf16.msra.mxu0 %v1119_v51  ;;  %v3211_v40 = vsel %vm75_vm1, 1.0, %v677_v11  ;;  %v813_v11 = vsel %vm76_vm0, 1.0, %v3149_v30 }
 0x338   :  { %777 = vadd.xlane.f32.xlu0 %v748_v54  ;;  %v614_v29 = vpop.permute.xlu0 %613  ;;  %v741_v44 = vmul.f32 %v3211_v40, %v3211_v40 }
 0x339   :  { %v3170_v2 = vsel %vm75_vm1, 1.0, %v683_v27  ;;  %v675_v60 = vmul.f32 %v614_v29, %v3118_v59 }
 0x33a   :  { %v649_v8 = vpop.permute.xlu1 %648  ;;  %v1118_v9 = vpack.c.bf16 %v3163_v36, %v3170_v2  ;;  %v747_v12 = vmul.f32 %v3170_v2, %v3170_v2 }
 0x33b   :  { %v682_v13 = vmul.f32 %v3128_v46, %v649_v8  ;;  %v3227_v59 = vsel %vm75_vm1, 1.0, %v675_v60 }
 0x33c   :  { %2359 = vmatprep.subr.bf16.mxu0 %v1118_v9  ;;  %775 = vadd.xlane.f32.xlu1 %v747_v12  ;;  %v604_v22 = vpop.permute.xlu0 %603 }
 0x33d   :  { %v3179_v5 = vsel %vm75_vm1, 1.0, %v682_v13  ;;  %2360 = vmatpush3.bf16.msra.mxu0 %v1118_v9  ;;  %v739_v9 = vmul.f32 %v3227_v59, %v3227_v59 }
 0x33e   :  { %v644_v20 = vpop.permute.xlu1 %643  ;;  %v746_v21 = vmul.f32 %v3179_v5, %v3179_v5 }
 0x33f   :  { %v681_v62 = vmul.f32 %v3124_v1, %v644_v20 }
 0x340   :  { %773 = vadd.xlane.f32.xlu0 %v746_v21  ;;  %v594_v54 = vpop.permute.xlu0 %593 }
 0x341   :  { %v3186_v63 = vsel %vm75_vm1, 1.0, %v681_v62  ;;  %v671_v13 = vmul.f32 %v594_v54, %v3110_v56 }
 0x342   :  { %v639_v46 = vpop.permute.xlu1 %638  ;;  %v1117_v24 = vpack.c.bf16 %v3179_v5, %v3186_v63  ;;  %v745_v25 = vmul.f32 %v3186_v63, %v3186_v63 }
 0x343   :  { %v680_v3 = vmul.f32 %v639_v46, %v3130_v0 }
 0x344   :  { %2361 = vmatprep.subr.bf16.mxu0 %v1117_v24  ;;  %771 = vadd.xlane.f32.xlu1 %v745_v25 }
 0x345   :  { %v3195_v1 = vsel %vm75_vm1, 1.0, %v680_v3  ;;  %2362 = vmatpush3.bf16.msra.mxu0 %v1117_v24 }
 0x346   :  { %v634_v7 = vpop.permute.xlu1 %633  ;;  %v744_v10 = vmul.f32 %v3195_v1, %v3195_v1 }
 0x347   :  { %v679_v14 = vmul.f32 %v634_v7, %v3126_v39 }
 0x348   :  { %769 = vadd.xlane.f32.xlu0 %v744_v10 }
 0x349   :  { %v3203_v0 = vsel %vm75_vm1, 1.0, %v679_v14 }
 0x34a   :  { %v629_v23 = vpop.permute.xlu1 %628  ;;  %v1116_v26 = vpack.c.bf16 %v3195_v1, %v3203_v0  ;;  %v743_v32 = vmul.f32 %v3203_v0, %v3203_v0 }
 0x34b   :  { %v678_v39 = vmul.f32 %v3120_v55, %v629_v23  ;;  %v673_v55 = vmul.f32 %v3108_v15, %v604_v22 }
 0x34c   :  { %2363 = vmatprep.subr.bf16.mxu0 %v1116_v26  ;;  %767 = vadd.xlane.f32.xlu1 %v743_v32  ;;  %v845_v32 = vmul.f32 -2.0, %v3149_v30  ;;  %v812_v30 = vsel %vm76_vm0, 1.0, %v3163_v36 }
 0x34d   :  { %v3217_v41 = vsel %vm75_vm1, 1.0, %v678_v39  ;;  %2364 = vmatpush3.bf16.msra.mxu0 %v1116_v26  ;;  %v846_v26 = vmul.f32 -2.0, %v3155_v43  ;;  %v814_v39 = vsel %vm76_vm0, 1.0, %v3155_v43  ;;  %v844_v43 = vmul.f32 -2.0, %v3163_v36 }
 0x34e   :  { %v619_v42 = vpop.permute.xlu1 %618  ;;  %v1115_v51 = vpack.c.bf16 %v3217_v41, %v3211_v40  ;;  %v742_v52 = vmul.f32 %v3217_v41, %v3217_v41  ;;  %v843_v36 = vmul.f32 -2.0, %v3170_v2 }
 0x34f   :  { %v676_v53 = vmul.f32 %v619_v42, %v3122_v61  ;;  %v3243_v61 = vsel %vm75_vm1, 1.0, %v673_v55 }
 0x350   :  { %763 = vadd.xlane.f32.xlu1 %v741_v44  ;;  %2365 = vmatprep.subr.bf16.mxu0 %v1115_v51  ;;  %v737_v62 = vmul.f32 %v3243_v61, %v3243_v61 }
 0x351   :  { %v3233_v27 = vsel %vm75_vm1, 1.0, %v676_v53  ;;  %765 = vadd.xlane.f32.xlu0 %v742_v52  ;;  %2366 = vmatpush3.bf16.msra.mxu0 %v1115_v51 }
 0x352   :  { %v609_v8 = vpop.permute.xlu1 %608  ;;  %v1114_v12 = vpack.c.bf16 %v3233_v27, %v3227_v59  ;;  %v740_v15 = vmul.f32 %v3233_v27, %v3233_v27 }
 0x353   :  { %v674_v38 = vmul.f32 %v3112_v57, %v609_v8  ;;  %v3259_v57 = vsel %vm75_vm1, 1.0, %v671_v13 }
 0x354   :  { %759 = vadd.xlane.f32.xlu1 %v739_v9  ;;  %2367 = vmatprep.subr.bf16.mxu0 %v1114_v12  ;;  %v735_v3 = vmul.f32 %v3259_v57, %v3259_v57 }
 0x355   :  { %v3249_v20 = vsel %vm75_vm1, 1.0, %v674_v38  ;;  %761 = vadd.xlane.f32.xlu0 %v740_v15  ;;  %2368 = vmatpush3.bf16.msra.mxu0 %v1114_v12  ;;  %v811_v15 = vsel %vm76_vm0, 1.0, %v3170_v2  ;;  %v842_v2 = vmul.f32 -2.0, %v3179_v5 }
 0x356   :  { %v599_v21 = vpop.permute.xlu1 %598  ;;  %v1113_v46 = vpack.c.bf16 %v3249_v20, %v3243_v61  ;;  %v738_v56 = vmul.f32 %v3249_v20, %v3249_v20 }
 0x357   :  { %v672_v24 = vmul.f32 %v599_v21, %v3114_v6 }
 0x358   :  { %755 = vadd.xlane.f32.xlu1 %v737_v62  ;;  %2369 = vmatprep.subr.bf16.mxu0 %v1113_v46 }
 0x359   :  { %v3264_v25 = vsel %vm75_vm1, 1.0, %v672_v24  ;;  %757 = vadd.xlane.f32.xlu0 %v738_v56  ;;  %2370 = vmatpush3.bf16.msra.mxu0 %v1113_v46  ;;  %v810_v56 = vsel %vm76_vm0, 1.0, %v3179_v5  ;;  %v841_v5 = vmul.f32 -2.0, %v3186_v63 }
 0x35a   :  { %v1112_v29 = vpack.c.bf16 %v3264_v25, %v3259_v57  ;;  %v736_v7 = vmul.f32 %v3264_v25, %v3264_v25 }
 0x35c   :  { %751 = vadd.xlane.f32.xlu1 %v735_v3  ;;  %2371 = vmatprep.subr.bf16.mxu0 %v1112_v29 }
 0x35d   :  { %753 = vadd.xlane.f32.xlu0 %v736_v7  ;;  %2372 = vmatpush3.bf16.msra.mxu0 %v1112_v29 }
 0x3bb   :  { %v780_v6 = vpop.xlane.xlu0 %779 }
 0x3bc   :  { %v2051_v10 = vadd.f32 -1.0, %v780_v6 }
 0x3be   :  { %v3277_v14 = vsel %vm75_vm1, %v2051_v10, %v813_v11  ;;  %v861_v51 = vsel %vm76_vm0, %v2051_v10, %v845_v32  ;;  %v809_v10 = vsel %vm76_vm0, 1.0, %v3186_v63 }
 0x3bf   :  { %v782_v22 = vpop.xlane.xlu1 %781  ;;  %v877_v8 = vsel %vm75_vm1, 1.0, %v861_v51  ;;  %v839_v51 = vmul.f32 -2.0, %v3203_v0 }
 0x3c0   :  { %v2052_v23 = vadd.f32 -1.0, %v782_v22 }
 0x3c1   :  { %v778_v60 = vpop.xlane.xlu0 %777 }
 0x3c2   :  { %v2050_v42 = vadd.f32 -1.0, %v778_v60  ;;  %v862_v44 = vsel %vm76_vm0, %v2052_v23, %v846_v26  ;;  %v3290_v52 = vsel %vm75_vm1, %v2052_v23, %v814_v39  ;;  %v840_v60 = vmul.f32 -2.0, %v3195_v1 }
 0x3c3   :  { %v878_v55 = vsel %vm75_vm1, 1.0, %v862_v44 }
 0x3c4   :  { %2301 = vmatprep.subr.mxu1 %v878_v55  ;;  %v3300_v53 = vsel %vm75_vm1, %v2050_v42, %v812_v30  ;;  %v860_v12 = vsel %vm76_vm0, %v2050_v42, %v844_v43 }
 0x3c5   :  { %2302 = vmatpush3.xpose.msra.mxu1 %v878_v55  ;;  %v776_v54 = vpop.xlane.xlu1 %775  ;;  %v876_v21 = vsel %vm75_vm1, 1.0, %v860_v12 }
 0x3c6   :  { %v2049_v9 = vadd.f32 -1.0, %v776_v54  ;;  %2303 = vmatprep.subr.mxu1 %v877_v8 }
 0x3c8   :  { %v3312_v13 = vsel %vm75_vm1, %v2049_v9, %v811_v15  ;;  %v859_v46 = vsel %vm76_vm0, %v2049_v9, %v843_v36  ;;  %v838_v9 = vmul.f32 -2.0, %v3217_v41 }
 0x3c9   :  { %v774_v38 = vpop.xlane.xlu0 %773  ;;  %2304 = vmatpush3.xpose.msra.mxu1 %v877_v8  ;;  %v875_v29 = vsel %vm75_vm1, 1.0, %v859_v46 }
 0x3ca   :  { %v2048_v62 = vadd.f32 -1.0, %v774_v38  ;;  %2305 = vmatprep.subr.mxu1 %v876_v21 }
 0x3cc   :  { %v3324_v24 = vsel %vm75_vm1, %v2048_v62, %v810_v56  ;;  %v858_v6 = vsel %vm76_vm0, %v2048_v62, %v842_v2  ;;  %v837_v62 = vmul.f32 -2.0, %v3211_v40 }
 0x3cd   :  { %2306 = vmatpush3.xpose.msra.mxu1 %v876_v21  ;;  %v772_v3 = vpop.xlane.xlu1 %771  ;;  %v874_v23 = vsel %vm75_vm1, 1.0, %v858_v6 }
 0x3ce   :  { %v2047_v7 = vadd.f32 -1.0, %v772_v3  ;;  %2307 = vmatprep.subr.mxu1 %v875_v29 }
 0x3d0   :  { %v3336_v11 = vsel %vm75_vm1, %v2047_v7, %v809_v10  ;;  %v857_v32 = vsel %vm76_vm0, %v2047_v7, %v841_v5 }
 0x3d1   :  { %v770_v22 = vpop.xlane.xlu0 %769  ;;  %2308 = vmatpush3.xpose.msra.mxu1 %v875_v29  ;;  %v873_v63 = vsel %vm75_vm1, 1.0, %v857_v32  ;;  %v836_v29 = vmul.f32 -2.0, %v3233_v27  ;;  %v799_v32 = vsel %vm76_vm0, 1.0, %v3259_v57 }
 0x3d2   :  { %v3340_v26 = vadd.f32 -1.0, %v770_v22  ;;  %2309 = vmatprep.subr.mxu1 %v874_v23 }
 0x3d4   :  { %v856_v44 = vsel %vm76_vm0, %v3340_v26, %v840_v60 }
 0x3d5   :  { %2310 = vmatpush3.xpose.msra.mxu1 %v874_v23  ;;  %v768_v39 = vpop.xlane.xlu1 %767  ;;  %v872_v30 = vsel %vm75_vm1, 1.0, %v856_v44 }
 0x3d6   :  { %v3347_v42 = vadd.f32 -1.0, %v768_v39  ;;  %2311 = vmatprep.subr.mxu1 %v873_v63  ;;  %v835_v39 = vmul.f32 -2.0, %v3227_v59 }
 0x3d8   :  { %v855_v54 = vsel %vm76_vm0, %v3347_v42, %v839_v51 }
 0x3d9   :  { %2312 = vmatpush3.xpose.msra.mxu1 %v873_v63  ;;  %v764_v55 = vpop.xlane.xlu1 %763  ;;  %v871_v15 = vsel %vm75_vm1, 1.0, %v855_v54 }
 0x3da   :  { %v766_v43 = vpop.xlane.xlu0 %765  ;;  %2313 = vmatprep.subr.mxu1 %v872_v30  ;;  %v3363_v36 = vadd.f32 -1.0, %v764_v55  ;;  %v834_v55 = vmul.f32 -2.0, %v3249_v20 }
 0x3db   :  { %v3358_v8 = vadd.f32 -1.0, %v766_v43 }
 0x3dc   :  { %v853_v3 = vsel %vm76_vm0, %v3363_v36, %v837_v62  ;;  %v832_v62 = vmul.f32 -2.0, %v3264_v25 }
 0x3dd   :  { %2314 = vmatpush3.xpose.msra.mxu1 %v872_v30  ;;  %v760_v12 = vpop.xlane.xlu1 %759  ;;  %v854_v38 = vsel %vm76_vm0, %v3358_v8, %v838_v9  ;;  %v869_v6 = vsel %vm75_vm1, 1.0, %v853_v3  ;;  %v831_v3 = vmul.f32 -2.0, %v3259_v57 }
 0x3de   :  { %2315 = vmatprep.subr.mxu1 %v871_v15  ;;  %v762_v21 = vpop.xlane.xlu0 %761  ;;  %v870_v56 = vsel %vm75_vm1, 1.0, %v854_v38  ;;  %v2041_v10 = vadd.f32 -1.0, %v760_v12  ;;  %v833_v12 = vmul.f32 -2.0, %v3243_v61 }
 0x3df   :  { %v2042_v2 = vadd.f32 -1.0, %v762_v21 }
 0x3e0   :  { %v851_v51 = vsel %vm76_vm0, %v2041_v10, %v835_v39  ;;  %v804_v39 = vsel %vm76_vm0, 1.0, %v3233_v27 }
 0x3e1   :  { %2316 = vmatpush3.xpose.msra.mxu1 %v871_v15  ;;  %v756_v46 = vpop.xlane.xlu1 %755  ;;  %v852_v22 = vsel %vm76_vm0, %v2042_v2, %v836_v29  ;;  %v867_v30 = vsel %vm75_vm1, 1.0, %v851_v51 }
 0x3e2   :  { %2317 = vmatprep.subr.mxu1 %v870_v56  ;;  %v758_v23 = vpop.xlane.xlu0 %757  ;;  %v868_v63 = vsel %vm75_vm1, 1.0, %v852_v22  ;;  %v2039_v43 = vadd.f32 -1.0, %v756_v46  ;;  %v800_v22 = vsel %vm76_vm0, 1.0, %v3264_v25  ;;  %v803_v25 = vsel %vm76_vm0, 1.0, %v3227_v59 }
 0x3e3   :  { %v2040_v44 = vadd.f32 -1.0, %v758_v23  ;;  %v801_v23 = vsel %vm76_vm0, 1.0, %v3243_v61  ;;  %v819_v61 = vsel %vm75_vm1, %v2041_v10, %v803_v25  ;;  %v806_v10 = vsel %vm76_vm0, 1.0, %v3217_v41 }
 0x3e4   :  { %v849_v21 = vsel %vm76_vm0, %v2039_v43, %v833_v12  ;;  %v822_v27 = vsel %vm75_vm1, %v3358_v8, %v806_v10 }
 0x3e5   :  { %2318 = vmatpush3.xpose.msra.mxu1 %v870_v56  ;;  %v752_v7 = vpop.xlane.xlu1 %751  ;;  %v850_v54 = vsel %vm76_vm0, %v2040_v44, %v834_v55  ;;  %v865_v46 = vsel %vm75_vm1, 1.0, %v849_v21 }
 0x3e6   :  { %v2037_v5 = vadd.f32 -1.0, %v752_v7  ;;  %2319 = vmatprep.subr.mxu1 %v869_v6  ;;  %v754_v9 = vpop.xlane.xlu0 %753  ;;  %v866_v15 = vsel %vm75_vm1, 1.0, %v850_v54 }
 0x3e7   :  { %v2038_v38 = vadd.f32 -1.0, %v754_v9 }
 0x3e8   :  { %v815_v60 = vsel %vm75_vm1, %v2037_v5, %v799_v32  ;;  %v847_v7 = vsel %vm76_vm0, %v2037_v5, %v831_v3  ;;  %v817_v5 = vsel %vm75_vm1, %v2039_v43, %v801_v23  ;;  %v802_v32 = vsel %vm76_vm0, 1.0, %v3249_v20 }
 0x3e9   :  { %2320 = vmatpush3.xpose.msra.mxu1 %v869_v6  ;;  %2333 = vmatprep.mubr.f32.mxu1 %v815_v60  ;;  %v848_v56 = vsel %vm76_vm0, %v2038_v38, %v832_v62  ;;  %v863_v6 = vsel %vm75_vm1, 1.0, %v847_v7  ;;  %v816_v57 = vsel %vm75_vm1, %v2038_v38, %v800_v22  ;;  %v818_v60 = vsel %vm75_vm1, %v2040_v44, %v802_v32 }
 0x3ea   :  { %2321 = vmatprep.subr.mxu1 %v868_v63  ;;  %v864_v29 = vsel %vm75_vm1, 1.0, %v848_v56  ;;  %v805_v20 = vsel %vm76_vm0, 1.0, %v3211_v40 }
 0x3eb   :  { %v821_v59 = vsel %vm75_vm1, %v3363_v36, %v805_v20  ;;  %v808_v36 = vsel %vm76_vm0, 1.0, %v3195_v1 }
 0x3ec   :  { %v824_v41 = vsel %vm75_vm1, %v3340_v26, %v808_v36 }
 0x3ed   :  { %2322 = vmatpush3.xpose.msra.mxu1 %v868_v63  ;;  %v820_v63 = vsel %vm75_vm1, %v2042_v2, %v804_v39  ;;  %v807_v2 = vsel %vm76_vm0, 1.0, %v3203_v0 }
 0x3ee   :  { %2323 = vmatprep.subr.mxu1 %v867_v30  ;;  %v823_v40 = vsel %vm75_vm1, %v3347_v42, %v807_v2 }
 0x3f1   :  { %2324 = vmatpush3.xpose.msra.mxu1 %v867_v30 }
 0x3f2   :  { %2325 = vmatprep.subr.mxu1 %v866_v15 }
 0x3f5   :  { %2326 = vmatpush3.xpose.msra.mxu1 %v866_v15 }
 0x3f6   :  { %2327 = vmatprep.subr.mxu1 %v865_v46 }
 0x3f9   :  { %2328 = vmatpush3.xpose.msra.mxu1 %v865_v46 }
 0x3fa   :  { %2329 = vmatprep.subr.mxu1 %v864_v29 }
 0x3fd   :  { %2330 = vmatpush3.xpose.msra.mxu1 %v864_v29 }
 0x3fe   :  { %2331 = vmatprep.subr.mxu1 %v863_v6 }
 0x401   :  { %2332 = vmatpush3.xpose.msra.mxu1 %v863_v6 }
 0x404   :  { %2334 = vmatmul.mubr.f32.vlgmr.msra.gmra.mxu1 %v816_v57 }
 0x405   :  { %2336 = vmatprep.mubr.f32.mxu1 %v817_v5 }
 0x408   :  { %2337 = vmatmul.mubr.f32.gmra.mxu1 %v818_v60 }
 0x409   :  { %2339 = vmatprep.mubr.f32.mxu1 %v819_v61 }
 0x40c   :  { %2340 = vmatmul.mubr.f32.gmra.mxu1 %v820_v63 }
 0x40d   :  { %2342 = vmatprep.mubr.f32.mxu1 %v821_v59 }
 0x410   :  { %2343 = vmatmul.mubr.f32.gmra.mxu1 %v822_v27 }
 0x411   :  { %2345 = vmatprep.mubr.f32.mxu1 %v823_v40 }
 0x414   :  { %2346 = vmatmul.mubr.f32.gmra.mxu1 %v824_v41 }
 0x415   :  { %2348 = vmatprep.mubr.f32.mxu1 %v3336_v11 }
 0x418   :  { %2349 = vmatmul.mubr.f32.gmra.mxu1 %v3324_v24 }
 0x419   :  { %2351 = vmatprep.mubr.f32.mxu1 %v3312_v13 }
 0x41c   :  { %2352 = vmatmul.mubr.f32.gmra.mxu1 %v3300_v53 }
 0x41d   :  { %2354 = vmatprep.mubr.f32.mxu1 %v3277_v14 }
 0x420   :  { %2355 = vmatmul.mubr.f32.gmra.mxu1 %v3290_v52 }
 0x4c4   :  { %v2335_v0 = vpop.f32.mrf.mxu1 }
 0x4c5   :  { %v1025_v42 = vmax.f32 %v2335_v0, 0.0 }
 0x4c6   :  { %v945_v1 = vpop.f32.mrf.mxu1 }
 0x4c7   :  { %v1041_v8 = vadd.f32 0.0001, %v1025_v42  ;;  %v1024_v44 = vmax.f32 %v945_v1, 0.0 }
 0x4c8   :  { %v2338_v51 = vpop.f32.mrf.mxu1 }
 0x4c9   :  { %2549 = vrsqrt.f32 %v1041_v8  ;;  %v1040_v26 = vadd.f32 0.0001, %v1024_v44  ;;  %v1027_v55 = vmax.f32 %v2338_v51, 0.0 }
 0x4ca   :  { %v955_v11 = vpop.f32.mrf.mxu1 }
 0x4cb   :  { %2551 = vrsqrt.f32 %v1040_v26  ;;  %v1043_v24 = vadd.f32 0.0001, %v1027_v55  ;;  %v1026_v30 = vmax.f32 %v955_v11, 0.0 }
 0x4cc   :  { %v2341_v13 = vpop.f32.mrf.mxu1 }
 0x4cd   :  { %2553 = vrsqrt.f32 %v1043_v24  ;;  %v1042_v53 = vadd.f32 0.0001, %v1026_v30  ;;  %v1029_v43 = vmax.f32 %v2341_v13, 0.0 }
 0x4ce   :  { %v965_v14 = vpop.f32.mrf.mxu1 }
 0x4cf   :  { %2555 = vrsqrt.f32 %v1042_v53  ;;  %v1045_v52 = vadd.f32 0.0001, %v1029_v43  ;;  %v1028_v54 = vmax.f32 %v965_v14, 0.0 }
 0x4d0   :  { %v2344_v9 = vpop.f32.mrf.mxu1 }
 0x4d1   :  { %2557 = vrsqrt.f32 %v1045_v52  ;;  %v1044_v12 = vadd.f32 0.0001, %v1028_v54  ;;  %v1031_v15 = vmax.f32 %v2344_v9, 0.0 }
 0x4d2   :  { %v975_v38 = vpop.f32.mrf.mxu1 }
 0x4d3   :  { %2559 = vrsqrt.f32 %v1044_v12  ;;  %v1047_v21 = vadd.f32 0.0001, %v1031_v15  ;;  %v1030_v62 = vmax.f32 %v975_v38, 0.0 }
 0x4d4   :  { %v2347_v46 = vpop.f32.mrf.mxu1 }
 0x4d5   :  { %2561 = vrsqrt.f32 %v1047_v21  ;;  %v1046_v56 = vadd.f32 0.0001, %v1030_v62  ;;  %v1033_v3 = vmax.f32 %v2347_v46, 0.0 }
 0x4d6   :  { %v2550_v29 = vpop.eup %2549  ;;  %v985_v7 = vpop.f32.mrf.mxu1 }
 0x4d7   :  { %2563 = vrsqrt.f32 %v1046_v56  ;;  %v1049_v6 = vadd.f32 0.0001, %v1033_v3  ;;  %v1032_v22 = vmax.f32 %v985_v7, 0.0  ;;  %v1089_v5 = vmul.f32 %v2550_v29, %v3060_v31 }
 0x4d8   :  { %v2552_v57 = vpop.eup %2551  ;;  %v2350_v23 = vpop.f32.mrf.mxu1 }
 0x4d9   :  { %2565 = vrsqrt.f32 %v1049_v6  ;;  %v1048_v32 = vadd.f32 0.0001, %v1032_v22  ;;  %v1035_v60 = vmax.f32 %v2350_v23, 0.0  ;;  %v1088_v25 = vmul.f32 %v2552_v57, %v3062_v35 }
 0x4da   :  { %v2554_v61 = vpop.eup %2553  ;;  %v995_v39 = vpop.f32.mrf.mxu1 }
 0x4db   :  { %2567 = vrsqrt.f32 %v1048_v32  ;;  %v1051_v63 = vadd.f32 0.0001, %v1035_v60  ;;  %v1034_v20 = vmax.f32 %v995_v39, 0.0  ;;  %v1104_v59 = vpack.c.bf16 %v1089_v5, %v1088_v25 }
 0x4dc   :  { %v2556_v10 = vpop.eup %2555  ;;  %v2353_v27 = vpop.f32.mrf.mxu1  ;;  %v1091_v2 = vmul.f32 %v2554_v61, %v3066_v50 }
 0x4dd   :  { %2569 = vrsqrt.f32 %v1051_v63  ;;  %v1050_v40 = vadd.f32 0.0001, %v1034_v20  ;;  %v1037_v36 = vmax.f32 %v2353_v27, 0.0  ;;  %2373 = vmatprep.mubr.bf16.mxu0 %v1104_v59  ;;  %v1090_v31 = vmul.f32 %v2556_v10, %v3068_v45 }
 0x4de   :  { %v2558_v41 = vpop.eup %2557  ;;  %v1005_v0 = vpop.f32.mrf.mxu1 }
 0x4df   :  { %2571 = vrsqrt.f32 %v1050_v40  ;;  %v1053_v35 = vadd.f32 0.0001, %v1037_v36  ;;  %v1036_v42 = vmax.f32 %v1005_v0, 0.0  ;;  %v1105_v1 = vpack.c.bf16 %v1091_v2, %v1090_v31 }
 0x4e0   :  { %v2560_v8 = vpop.eup %2559  ;;  %v2356_v44 = vpop.f32.mrf.mxu1  ;;  %v1093_v51 = vmul.f32 %v2558_v41, %v3072_v58 }
 0x4e1   :  { %2573 = vrsqrt.f32 %v1053_v35  ;;  %v1052_v26 = vadd.f32 0.0001, %v1036_v42  ;;  %v1039_v55 = vmax.f32 %v2356_v44, 0.0  ;;  %2374 = vmatmul.mubr.bf16.vlgmr.msra.gmra.mxu0 %v1105_v1  ;;  %v1092_v50 = vmul.f32 %v2560_v8, %v3074_v47 }
 0x4e2   :  { %v2562_v11 = vpop.eup %2561  ;;  %v1015_v24 = vpop.f32.mrf.mxu1 }
 0x4e3   :  { %2575 = vrsqrt.f32 %v1052_v26  ;;  %v1055_v45 = vadd.f32 0.0001, %v1039_v55  ;;  %v1038_v30 = vmax.f32 %v1015_v24, 0.0  ;;  %v1106_v13 = vpack.c.bf16 %v1093_v51, %v1092_v50 }
 0x4e4   :  { %v2564_v53 = vpop.eup %2563  ;;  %v1095_v58 = vmul.f32 %v2562_v11, %v3080_v17 }
 0x4e5   :  { %2577 = vrsqrt.f32 %v1055_v45  ;;  %v1054_v43 = vadd.f32 0.0001, %v1038_v30  ;;  %2377 = vmatprep.mubr.bf16.mxu0 %v1106_v13  ;;  %v1094_v14 = vmul.f32 %v2564_v53, %v3078_v16 }
 0x4e6   :  { %v2566_v52 = vpop.eup %2565 }
 0x4e7   :  { %2579 = vrsqrt.f32 %v1054_v43  ;;  %v1107_v54 = vpack.c.bf16 %v1095_v58, %v1094_v14  ;;  %v1097_v12 = vmul.f32 %v2566_v52, %v3086_v28 }
 0x4e8   :  { %v2568_v9 = vpop.eup %2567 }
 0x4e9   :  { %2378 = vmatmul.mubr.bf16.gmra.mxu0 %v1107_v54  ;;  %v1096_v47 = vmul.f32 %v2568_v9, %v3084_v4 }
 0x4ea   :  { %v2570_v15 = vpop.eup %2569 }
 0x4eb   :  { %v1108_v38 = vpack.c.bf16 %v1097_v12, %v1096_v47  ;;  %v1099_v46 = vmul.f32 %v2570_v15, %v3092_v19 }
 0x4ec   :  { %v2572_v21 = vpop.eup %2571 }
 0x4ed   :  { %2381 = vmatprep.mubr.bf16.mxu0 %v1108_v38  ;;  %v1098_v62 = vmul.f32 %v2572_v21, %v3090_v18 }
 0x4ee   :  { %v2574_v16 = vpop.eup %2573 }
 0x4ef   :  { %v1109_v56 = vpack.c.bf16 %v1099_v46, %v1098_v62  ;;  %v1101_v29 = vmul.f32 %v2574_v16, %v3098_v37 }
 0x4f0   :  { %v2576_v17 = vpop.eup %2575 }
 0x4f1   :  { %2382 = vmatmul.mubr.bf16.gmra.mxu0 %v1109_v56  ;;  %v1100_v3 = vmul.f32 %v2576_v17, %v3096_v33 }
 0x4f2   :  { %v2578_v7 = vpop.eup %2577 }
 0x4f3   :  { %v1110_v4 = vpack.c.bf16 %v1101_v29, %v1100_v3  ;;  %v1103_v22 = vmul.f32 %v2578_v7, %v3104_v49 }
 0x4f4   :  { %v2580_v6 = vpop.eup %2579 }
 0x4f5   :  { %2385 = vmatprep.mubr.bf16.mxu0 %v1110_v4  ;;  %v1102_v28 = vmul.f32 %v2580_v6, %v3102_v48 }
 0x4f7   :  { %v1111_v57 = vpack.c.bf16 %v1103_v22, %v1102_v28 }
 0x4f9   :  { %2386 = vmatmul.mubr.bf16.gmra.mxu0 %v1111_v57 }
 0x5a1   :  { %v3482_v18 = vpop.f32.mrf.mxu0 }
 0x5a3   :  { %v3484_v19 = vpop.f32.mrf.mxu0 }
 0x5a5   :  { %v3486_v23 = vpop.f32.mrf.mxu0 }
 0x5a7   :  { %v3488_v5 = vpop.f32.mrf.mxu0 }
 0x5a9   :  { %v3490_v33 = vpop.f32.mrf.mxu0 }
 0x5ab   :  { %v3492_v37 = vpop.f32.mrf.mxu0 }
 0x5ad   :  { %v3494_v32 = vpop.f32.mrf.mxu0 }
 0x5af   :  { %v3496_v60 = vpop.f32.mrf.mxu0 }
 0x5b1   :  { %v3498_v48 = vpop.f32.mrf.mxu0 }
 0x5b3   :  { %v3500_v49 = vpop.f32.mrf.mxu0 }
 0x5b5   :  { %v3502_v25 = vpop.f32.mrf.mxu0 }
 0x5b7   :  { %v3504_v61 = vpop.f32.mrf.mxu0 }
 0x5b9   :  { %v2387_v39 = vpop.f32.mrf.mxu0 }
 0x5ba   :  { %2581 = vrcp.f32 %v2387_v39 }
 0x5bb   :  { %v3506_v63 = vpop.f32.mrf.mxu0 }
 0x5bd   :  { %v2388_v20 = vpop.f32.mrf.mxu0 }
 0x5be   :  { %2583 = vrcp.f32 %v2388_v20 }
 0x5bf   :  { %v1205_v59 = vpop.f32.mrf.mxu0 }
 0x5c0   :  { %2585 = vrcp.f32 %v1205_v59 }
 0x5c1   :  { %2587 = vrcp.f32 %v3506_v63 }
 0x5c2   :  { %2589 = vrcp.f32 %v3502_v25 }
 0x5c3   :  { %2591 = vrcp.f32 %v3498_v48 }
 0x5c4   :  { %2593 = vrcp.f32 %v3504_v61 }
 0x5c5   :  { %2595 = vrcp.f32 %v3500_v49 }
 0x5c6   :  { %2597 = vrcp.f32 %v3494_v32 }
 0x5c7   :  { %v2582_v10 = vpop.eup %2581  ;;  %2599 = vrcp.f32 %v3490_v33 }
 0x5c8   :  { %1305 = vperm.xlu1 %2484, %v2582_v10   ;;  %2601 = vrcp.f32 %v3496_v60 }
 0x5c9   :  { %2603 = vrcp.f32 %v3492_v37 }
 0x5ca   :  { %2605 = vrcp.f32 %v3486_v23 }
 0x5cb   :  { %v2584_v27 = vpop.eup %2583  ;;  %2607 = vrcp.f32 %v3482_v18 }
 0x5cc   :  { %1310 = vperm.xlu0 %2483, %v2584_v27   ;;  %2609 = vrcp.f32 %v3488_v5 }
 0x5cd   :  { %v2586_v2 = vpop.eup %2585  ;;  %2611 = vrcp.f32 %v3484_v19 }
 0x5ce   :  { %1300 = vperm.xlu1 %2484, %v2586_v2   ;;  %v2588_v40 = vpop.eup %2587 }
 0x5cf   :  { %v2590_v36 = vpop.eup %2589 }
 0x5d0   :  { %1295 = vperm.xlu0 %2483, %v2588_v40   ;;  %v2592_v31 = vpop.eup %2591 }
 0x5d1   :  { %v2594_v41 = vpop.eup %2593 }
 0x5d2   :  { %1290 = vperm.xlu1 %2484, %v2590_v36   ;;  %v2596_v0 = vpop.eup %2595 }
 0x5d3   :  { %v2598_v35 = vpop.eup %2597 }
 0x5d4   :  { %1285 = vperm.xlu0 %2483, %v2592_v31   ;;  %v2600_v42 = vpop.eup %2599 }
 0x5d5   :  { %v2602_v1 = vpop.eup %2601 }
 0x5d6   :  { %1280 = vperm.xlu1 %2484, %v2594_v41   ;;  %v2604_v8 = vpop.eup %2603 }
 0x5d7   :  { %v2606_v44 = vpop.eup %2605 }
 0x5d8   :  { %1275 = vperm.xlu0 %2483, %v2596_v0   ;;  %v2608_v51 = vpop.eup %2607 }
 0x5d9   :  { %v2610_v26 = vpop.eup %2609 }
 0x5da   :  { %1270 = vperm.xlu1 %2484, %v2598_v35   ;;  %v2612_v55 = vpop.eup %2611 }
 0x5dc   :  { %1265 = vperm.xlu0 %2483, %v2600_v42  }
 0x5de   :  { %1260 = vperm.xlu1 %2484, %v2602_v1  }
 0x5e0   :  { %1255 = vperm.xlu0 %2483, %v2604_v8  }
 0x5e2   :  { %1250 = vperm.xlu1 %2484, %v2606_v44  }
 0x5e4   :  { %1245 = vperm.xlu0 %2483, %v2608_v51  }
 0x5e6   :  { %1240 = vperm.xlu1 %2484, %v2610_v26  }
 0x5e8   :  { %1235 = vperm.xlu0 %2483, %v2612_v55  }
 0x643   :  { %v1306_v50 = vpop.permute.xlu1 %1305 }
 0x644   :  { %v1327_v11 = vmul.f32 %v2387_v39, %v1306_v50 }
 0x646   :  { %v3523_v24 = vsel %vm75_vm1, 1.0, %v1327_v11 }
 0x647   :  { %v1311_v45 = vpop.permute.xlu0 %1310  ;;  %v1391_v30 = vmul.f32 %v3523_v24, %v3523_v24 }
 0x648   :  { %v1328_v13 = vmul.f32 %v2388_v20, %v1311_v45 }
 0x649   :  { %v1301_v53 = vpop.permute.xlu1 %1300  ;;  %1421 = vadd.xlane.f32.xlu0 %v1391_v30 }
 0x64a   :  { %v3529_v43 = vsel %vm75_vm1, 1.0, %v1328_v13  ;;  %v1326_v14 = vmul.f32 %v1301_v53, %v1205_v59 }
 0x64b   :  { %v1296_v58 = vpop.permute.xlu0 %1295  ;;  %v1761_v52 = vpack.c.bf16 %v3529_v43, %v3523_v24  ;;  %v1392_v54 = vmul.f32 %v3529_v43, %v3529_v43 }
 0x64c   :  { %v3537_v9 = vsel %vm75_vm1, 1.0, %v1326_v14  ;;  %v1325_v47 = vmul.f32 %v1296_v58, %v3506_v63 }
 0x64d   :  { %v1291_v12 = vpop.permute.xlu1 %1290  ;;  %2445 = vmatprep.subr.bf16.mxu1 %v1761_v52  ;;  %1423 = vadd.xlane.f32.xlu1 %v1392_v54  ;;  %v1390_v15 = vmul.f32 %v3537_v9, %v3537_v9 }
 0x64e   :  { %v3544_v38 = vsel %vm75_vm1, 1.0, %v1325_v47  ;;  %v1324_v21 = vmul.f32 %v3502_v25, %v1291_v12  ;;  %2446 = vmatpush3.bf16.msra.mxu1 %v1761_v52  ;;  %v1455_v12 = vsel %vm76_vm0, 1.0, %v3523_v24 }
 0x64f   :  { %v1286_v62 = vpop.permute.xlu0 %1285  ;;  %1419 = vadd.xlane.f32.xlu0 %v1390_v15  ;;  %v1389_v46 = vmul.f32 %v3544_v38, %v3544_v38  ;;  %v1760_v16 = vpack.c.bf16 %v3537_v9, %v3544_v38 }
 0x650   :  { %v3553_v56 = vsel %vm75_vm1, 1.0, %v1324_v21  ;;  %v1323_v17 = vmul.f32 %v3498_v48, %v1286_v62 }
 0x651   :  { %v1281_v3 = vpop.permute.xlu1 %1280  ;;  %1417 = vadd.xlane.f32.xlu1 %v1389_v46  ;;  %2447 = vmatprep.subr.bf16.mxu1 %v1760_v16  ;;  %v1388_v29 = vmul.f32 %v3553_v56, %v3553_v56  ;;  %v1488_v46 = vmul.f32 -2.0, %v3529_v43 }
 0x652   :  { %v3560_v7 = vsel %vm75_vm1, 1.0, %v1323_v17  ;;  %v1322_v4 = vmul.f32 %v1281_v3, %v3504_v61  ;;  %2448 = vmatpush3.bf16.msra.mxu1 %v1760_v16  ;;  %v1487_v16 = vmul.f32 -2.0, %v3523_v24  ;;  %v1456_v3 = vsel %vm76_vm0, 1.0, %v3529_v43 }
 0x653   :  { %v1276_v6 = vpop.permute.xlu0 %1275  ;;  %1415 = vadd.xlane.f32.xlu0 %v1388_v29  ;;  %v1387_v28 = vmul.f32 %v3560_v7, %v3560_v7  ;;  %v1759_v22 = vpack.c.bf16 %v3553_v56, %v3560_v7 }
 0x654   :  { %v3569_v57 = vsel %vm75_vm1, 1.0, %v1322_v4  ;;  %v1321_v48 = vmul.f32 %v1276_v6, %v3500_v49 }
 0x655   :  { %v1271_v25 = vpop.permute.xlu1 %1270  ;;  %1413 = vadd.xlane.f32.xlu1 %v1387_v28  ;;  %2449 = vmatprep.subr.bf16.mxu1 %v1759_v22  ;;  %v1386_v61 = vmul.f32 %v3569_v57, %v3569_v57 }
 0x656   :  { %v3576_v39 = vsel %vm75_vm1, 1.0, %v1321_v48  ;;  %v1320_v63 = vmul.f32 %v3494_v32, %v1271_v25  ;;  %2450 = vmatpush3.bf16.msra.mxu1 %v1759_v22  ;;  %v1454_v48 = vsel %vm76_vm0, 1.0, %v3537_v9  ;;  %v1486_v25 = vmul.f32 -2.0, %v3537_v9 }
 0x657   :  { %v1266_v20 = vpop.permute.xlu0 %1265  ;;  %1411 = vadd.xlane.f32.xlu0 %v1386_v61  ;;  %v1385_v59 = vmul.f32 %v3576_v39, %v3576_v39  ;;  %v1758_v49 = vpack.c.bf16 %v3569_v57, %v3576_v39 }
 0x658   :  { %v3585_v10 = vsel %vm75_vm1, 1.0, %v1320_v63  ;;  %v1319_v27 = vmul.f32 %v3490_v33, %v1266_v20 }
 0x659   :  { %v1261_v2 = vpop.permute.xlu1 %1260  ;;  %1409 = vadd.xlane.f32.xlu1 %v1385_v59  ;;  %2451 = vmatprep.subr.bf16.mxu1 %v1758_v49  ;;  %v1384_v32 = vmul.f32 %v3585_v10, %v3585_v10  ;;  %v1453_v59 = vsel %vm76_vm0, 1.0, %v3544_v38 }
 0x65a   :  { %v3592_v40 = vsel %vm75_vm1, 1.0, %v1319_v27  ;;  %v1318_v36 = vmul.f32 %v1261_v2, %v3496_v60  ;;  %2452 = vmatpush3.bf16.msra.mxu1 %v1758_v49 }
 0x65b   :  { %v1256_v31 = vpop.permute.xlu0 %1255  ;;  %1407 = vadd.xlane.f32.xlu0 %v1384_v32  ;;  %v1383_v41 = vmul.f32 %v3592_v40, %v3592_v40  ;;  %v1757_v33 = vpack.c.bf16 %v3585_v10, %v3592_v40  ;;  %v1452_v32 = vsel %vm76_vm0, 1.0, %v3553_v56 }
 0x65c   :  { %v3601_v0 = vsel %vm75_vm1, 1.0, %v1318_v36  ;;  %v1317_v35 = vmul.f32 %v1256_v31, %v3492_v37  ;;  %v1485_v31 = vmul.f32 -2.0, %v3544_v38 }
 0x65d   :  { %v1251_v42 = vpop.permute.xlu1 %1250  ;;  %1405 = vadd.xlane.f32.xlu1 %v1383_v41  ;;  %2453 = vmatprep.subr.bf16.mxu1 %v1757_v33  ;;  %v1382_v60 = vmul.f32 %v3601_v0, %v3601_v0 }
 0x65e   :  { %v3608_v1 = vsel %vm75_vm1, 1.0, %v1317_v35  ;;  %v1316_v8 = vmul.f32 %v3486_v23, %v1251_v42  ;;  %2454 = vmatpush3.bf16.msra.mxu1 %v1757_v33  ;;  %v1451_v35 = vsel %vm76_vm0, 1.0, %v3560_v7 }
 0x65f   :  { %v1246_v44 = vpop.permute.xlu0 %1245  ;;  %1403 = vadd.xlane.f32.xlu0 %v1382_v60  ;;  %v1381_v51 = vmul.f32 %v3608_v1, %v3608_v1  ;;  %v1756_v37 = vpack.c.bf16 %v3601_v0, %v3608_v1 }
 0x660   :  { %v3617_v26 = vsel %vm75_vm1, 1.0, %v1316_v8  ;;  %v1315_v55 = vmul.f32 %v3482_v18, %v1246_v44  ;;  %v1484_v8 = vmul.f32 -2.0, %v3553_v56 }
 0x661   :  { %v1241_v50 = vpop.permute.xlu1 %1240  ;;  %1401 = vadd.xlane.f32.xlu1 %v1381_v51  ;;  %2455 = vmatprep.subr.bf16.mxu1 %v1756_v37  ;;  %v1380_v23 = vmul.f32 %v3617_v26, %v3617_v26 }
 0x662   :  { %v3624_v11 = vsel %vm75_vm1, 1.0, %v1315_v55  ;;  %v1314_v45 = vmul.f32 %v1241_v50, %v3488_v5  ;;  %2456 = vmatpush3.bf16.msra.mxu1 %v1756_v37  ;;  %v1483_v50 = vmul.f32 -2.0, %v3560_v7 }
 0x663   :  { %v1236_v30 = vpop.permute.xlu0 %1235  ;;  %1399 = vadd.xlane.f32.xlu0 %v1380_v23  ;;  %v1379_v13 = vmul.f32 %v3624_v11, %v3624_v11  ;;  %v1755_v18 = vpack.c.bf16 %v3617_v26, %v3624_v11 }
 0x664   :  { %v3633_v53 = vsel %vm75_vm1, 1.0, %v1314_v45  ;;  %v1313_v14 = vmul.f32 %v1236_v30, %v3484_v19 }
 0x665   :  { %1397 = vadd.xlane.f32.xlu1 %v1379_v13  ;;  %2457 = vmatprep.subr.bf16.mxu1 %v1755_v18  ;;  %v1378_v5 = vmul.f32 %v3633_v53, %v3633_v53  ;;  %v1482_v13 = vmul.f32 -2.0, %v3569_v57 }
 0x666   :  { %v3640_v58 = vsel %vm75_vm1, 1.0, %v1313_v14  ;;  %2458 = vmatpush3.bf16.msra.mxu1 %v1755_v18 }
 0x667   :  { %1395 = vadd.xlane.f32.xlu0 %v1378_v5  ;;  %v1377_v52 = vmul.f32 %v3640_v58, %v3640_v58  ;;  %v1754_v54 = vpack.c.bf16 %v3633_v53, %v3640_v58 }
 0x669   :  { %1393 = vadd.xlane.f32.xlu1 %v1377_v52  ;;  %2459 = vmatprep.subr.bf16.mxu1 %v1754_v54 }
 0x66a   :  { %2460 = vmatpush3.bf16.msra.mxu1 %v1754_v54  ;;  %v1481_v54 = vmul.f32 -2.0, %v3576_v39 }
 0x6d2   :  { %v1422_v19 = vpop.xlane.xlu0 %1421 }
 0x6d3   :  { %v2067_v47 = vadd.f32 -1.0, %v1422_v19 }
 0x6d5   :  { %v3651_v15 = vsel %vm75_vm1, %v2067_v47, %v1455_v12  ;;  %v1503_v6 = vsel %vm76_vm0, %v2067_v47, %v1487_v16 }
 0x6d6   :  { %v1424_v21 = vpop.xlane.xlu1 %1423  ;;  %v1519_v20 = vsel %vm75_vm1, 1.0, %v1503_v6 }
 0x6d7   :  { %v2068_v62 = vadd.f32 -1.0, %v1424_v21 }
 0x6d8   :  { %v1420_v17 = vpop.xlane.xlu0 %1419 }
 0x6d9   :  { %v2066_v29 = vadd.f32 -1.0, %v1420_v17  ;;  %v1504_v4 = vsel %vm76_vm0, %v2068_v62, %v1488_v46  ;;  %v3664_v28 = vsel %vm75_vm1, %v2068_v62, %v1456_v3  ;;  %v1480_v46 = vmul.f32 -2.0, %v3585_v10 }
 0x6da   :  { %v1418_v22 = vpop.xlane.xlu1 %1417  ;;  %v1520_v24 = vsel %vm75_vm1, 1.0, %v1504_v4  ;;  %v1441_v17 = vsel %vm76_vm0, 1.0, %v3640_v58 }
 0x6db   :  { %v2065_v43 = vadd.f32 -1.0, %v1418_v22  ;;  %2389 = vmatprep.subr.mxu0 %v1520_v24  ;;  %v3674_v61 = vsel %vm75_vm1, %v2066_v29, %v1454_v48  ;;  %v1502_v27 = vsel %vm76_vm0, %v2066_v29, %v1486_v25  ;;  %v1479_v22 = vmul.f32 -2.0, %v3592_v40 }
 0x6dc   :  { %v1416_v63 = vpop.xlane.xlu0 %1415  ;;  %2390 = vmatpush3.xpose.msra.mxu0 %v1520_v24  ;;  %v1518_v33 = vsel %vm75_vm1, 1.0, %v1502_v27  ;;  %v1478_v25 = vmul.f32 -2.0, %v3601_v0  ;;  %v1477_v27 = vmul.f32 -2.0, %v3608_v1 }
 0x6dd   :  { %v2064_v49 = vadd.f32 -1.0, %v1416_v63  ;;  %2391 = vmatprep.subr.mxu0 %v1519_v20  ;;  %v3685_v9 = vsel %vm75_vm1, %v2065_v43, %v1453_v59  ;;  %v1501_v42 = vsel %vm76_vm0, %v2065_v43, %v1485_v31  ;;  %v1476_v31 = vmul.f32 -2.0, %v3617_v26 }
 0x6de   :  { %v1414_v2 = vpop.xlane.xlu1 %1413  ;;  %v1517_v44 = vsel %vm75_vm1, 1.0, %v1501_v42 }
 0x6df   :  { %v2063_v36 = vadd.f32 -1.0, %v1414_v2  ;;  %v3693_v41 = vsel %vm75_vm1, %v2064_v49, %v1452_v32  ;;  %v1500_v51 = vsel %vm76_vm0, %v2064_v49, %v1484_v8  ;;  %v1475_v8 = vmul.f32 -2.0, %v3624_v11 }
 0x6e0   :  { %2392 = vmatpush3.xpose.msra.mxu0 %v1519_v20  ;;  %v1412_v37 = vpop.xlane.xlu0 %1411  ;;  %v1516_v23 = vsel %vm75_vm1, 1.0, %v1500_v51 }
 0x6e1   :  { %2393 = vmatprep.subr.mxu0 %v1518_v33  ;;  %v3704_v60 = vsel %vm75_vm1, %v2063_v36, %v1451_v35  ;;  %v3714_v45 = vadd.f32 -1.0, %v1412_v37  ;;  %v1499_v56 = vsel %vm76_vm0, %v2063_v36, %v1483_v50 }
 0x6e2   :  { %v1410_v38 = vpop.xlane.xlu1 %1409  ;;  %v1515_v18 = vsel %vm75_vm1, 1.0, %v1499_v56  ;;  %v1473_v56 = vmul.f32 -2.0, %v3640_v58 }
 0x6e3   :  { %v3721_v14 = vadd.f32 -1.0, %v1410_v38  ;;  %v1498_v7 = vsel %vm76_vm0, %v3714_v45, %v1482_v13 }
 0x6e4   :  { %2394 = vmatpush3.xpose.msra.mxu0 %v1518_v33  ;;  %v1408_v5 = vpop.xlane.xlu0 %1407  ;;  %v1514_v19 = vsel %vm75_vm1, 1.0, %v1498_v7  ;;  %v1442_v7 = vsel %vm76_vm0, 1.0, %v3633_v53 }
 0x6e5   :  { %2395 = vmatprep.subr.mxu0 %v1517_v44  ;;  %v3729_v47 = vadd.f32 -1.0, %v1408_v5  ;;  %v1497_v12 = vsel %vm76_vm0, %v3721_v14, %v1481_v54  ;;  %v1443_v5 = vsel %vm76_vm0, 1.0, %v3624_v11  ;;  %v1444_v54 = vsel %vm76_vm0, 1.0, %v3617_v26 }
 0x6e6   :  { %v1406_v55 = vpop.xlane.xlu1 %1405  ;;  %v1513_v16 = vsel %vm75_vm1, 1.0, %v1497_v12  ;;  %v1446_v12 = vsel %vm76_vm0, 1.0, %v3601_v0  ;;  %v1447_v26 = vsel %vm76_vm0, 1.0, %v3592_v40 }
 0x6e7   :  { %v3740_v3 = vadd.f32 -1.0, %v1406_v55  ;;  %v1496_v4 = vsel %vm76_vm0, %v3729_v47, %v1480_v46  ;;  %v1474_v55 = vmul.f32 -2.0, %v3633_v53  ;;  %v1445_v53 = vsel %vm76_vm0, 1.0, %v3608_v1 }
 0x6e8   :  { %2396 = vmatpush3.xpose.msra.mxu0 %v1517_v44  ;;  %v1404_v6 = vpop.xlane.xlu0 %1403  ;;  %v1512_v24 = vsel %vm75_vm1, 1.0, %v1496_v4  ;;  %v1449_v46 = vsel %vm76_vm0, 1.0, %v3576_v39 }
 0x6e9   :  { %2397 = vmatprep.subr.mxu0 %v1516_v23  ;;  %v2058_v48 = vadd.f32 -1.0, %v1404_v6  ;;  %v1495_v43 = vsel %vm76_vm0, %v3740_v3, %v1479_v22  ;;  %v1463_v1 = vsel %vm75_vm1, %v3740_v3, %v1447_v26  ;;  %v1465_v40 = vsel %vm75_vm1, %v3721_v14, %v1449_v46 }
 0x6ea   :  { %v1402_v30 = vpop.xlane.xlu1 %1401  ;;  %v1511_v63 = vsel %vm75_vm1, 1.0, %v1495_v43 }
 0x6eb   :  { %v2057_v20 = vadd.f32 -1.0, %v1402_v30  ;;  %v1494_v59 = vsel %vm76_vm0, %v2058_v48, %v1478_v25 }
 0x6ec   :  { %2398 = vmatpush3.xpose.msra.mxu0 %v1516_v23  ;;  %v1400_v49 = vpop.xlane.xlu0 %1399  ;;  %v1510_v2 = vsel %vm75_vm1, 1.0, %v1494_v59 }
 0x6ed   :  { %2399 = vmatprep.subr.mxu0 %v1515_v18  ;;  %v2056_v32 = vadd.f32 -1.0, %v1400_v49  ;;  %v1493_v36 = vsel %vm76_vm0, %v2057_v20, %v1477_v27  ;;  %v1461_v11 = vsel %vm75_vm1, %v2057_v20, %v1445_v53  ;;  %v1719_v53 = vld [vmem:[#allocation2 + $0x28] sm:$0xff] }
 0x6ee   :  { %v1398_v52 = vpop.xlane.xlu1 %1397  ;;  %v1509_v33 = vsel %vm75_vm1, 1.0, %v1493_v36 }
 0x6ef   :  { %v2055_v35 = vadd.f32 -1.0, %v1398_v52  ;;  %v1492_v42 = vsel %vm76_vm0, %v2056_v32, %v1476_v31  ;;  %v1714_v31 = vld [vmem:[#allocation2] sm:$0xff] }
 0x6f0   :  { %2400 = vmatpush3.xpose.msra.mxu0 %v1515_v18  ;;  %v1396_v38 = vpop.xlane.xlu0 %1395  ;;  %v1508_v44 = vsel %vm75_vm1, 1.0, %v1492_v42 }
 0x6f1   :  { %2401 = vmatprep.subr.mxu0 %v1514_v19  ;;  %v2054_v51 = vadd.f32 -1.0, %v1396_v38  ;;  %v1491_v37 = vsel %vm76_vm0, %v2055_v35, %v1475_v8  ;;  %v1459_v52 = vsel %vm75_vm1, %v2055_v35, %v1443_v5 }
 0x6f2   :  { %v1394_v21 = vpop.xlane.xlu1 %1393  ;;  %v1507_v50 = vsel %vm75_vm1, 1.0, %v1491_v37 }
 0x6f3   :  { %v2053_v62 = vadd.f32 -1.0, %v1394_v21  ;;  %v1490_v23 = vsel %vm76_vm0, %v2054_v51, %v1474_v55  ;;  %v1458_v58 = vsel %vm75_vm1, %v2054_v51, %v1442_v7  ;;  %v1462_v21 = vsel %vm75_vm1, %v2058_v48, %v1446_v12  ;;  %v1717_v55 = vld [vmem:[#allocation2 + $0x18] sm:$0xff] }
 0x6f4   :  { %2402 = vmatpush3.xpose.msra.mxu0 %v1514_v19  ;;  %v1506_v30 = vsel %vm75_vm1, 1.0, %v1490_v23  ;;  %v1460_v19 = vsel %vm75_vm1, %v2056_v32, %v1444_v54 }
 0x6f5   :  { %2403 = vmatprep.subr.mxu0 %v1513_v16  ;;  %v1457_v29 = vsel %vm75_vm1, %v2053_v62, %v1441_v17  ;;  %v1489_v13 = vsel %vm76_vm0, %v2053_v62, %v1473_v56  ;;  %v1448_v62 = vsel %vm76_vm0, 1.0, %v3585_v10  ;;  %v1716_v56 = vld [vmem:[#allocation2 + $0x10] sm:$0xff] }
 0x6f6   :  { %2421 = vmatprep.mubr.f32.mxu0 %v1457_v29  ;;  %v1505_v18 = vsel %vm75_vm1, 1.0, %v1489_v13  ;;  %v1464_v0 = vsel %vm75_vm1, %v3729_v47, %v1448_v62 }
 0x6f8   :  { %2404 = vmatpush3.xpose.msra.mxu0 %v1513_v16  ;;  %v1450_v16 = vsel %vm76_vm0, 1.0, %v3569_v57 }
 0x6f9   :  { %2405 = vmatprep.subr.mxu0 %v1512_v24  ;;  %v1466_v10 = vsel %vm75_vm1, %v3714_v45, %v1450_v16 }
 0x6fc   :  { %2406 = vmatpush3.xpose.msra.mxu0 %v1512_v24 }
 0x6fd   :  { %2407 = vmatprep.subr.mxu0 %v1511_v63 }
 0x700   :  { %2408 = vmatpush3.xpose.msra.mxu0 %v1511_v63 }
 0x701   :  { %2409 = vmatprep.subr.mxu0 %v1510_v2 }
 0x704   :  { %2410 = vmatpush3.xpose.msra.mxu0 %v1510_v2  ;;  %v1715_v2 = vld [vmem:[#allocation2 + $0x8] sm:$0xff] }
 0x705   :  { %2411 = vmatprep.subr.mxu0 %v1509_v33 }
 0x708   :  { %2412 = vmatpush3.xpose.msra.mxu0 %v1509_v33 }
 0x709   :  { %2413 = vmatprep.subr.mxu0 %v1508_v44 }
 0x70c   :  { %2414 = vmatpush3.xpose.msra.mxu0 %v1508_v44 }
 0x70d   :  { %2415 = vmatprep.subr.mxu0 %v1507_v50 }
 0x710   :  { %2416 = vmatpush3.xpose.msra.mxu0 %v1507_v50 }
 0x711   :  { %2417 = vmatprep.subr.mxu0 %v1506_v30 }
 0x714   :  { %2418 = vmatpush3.xpose.msra.mxu0 %v1506_v30 }
 0x715   :  { %2419 = vmatprep.subr.mxu0 %v1505_v18 }
 0x718   :  { %2420 = vmatpush3.xpose.msra.mxu0 %v1505_v18 }
 0x71b   :  { %2422 = vmatmul.mubr.f32.vlgmr.msra.gmra.mxu0 %v1458_v58 }
 0x71c   :  { %2424 = vmatprep.mubr.f32.mxu0 %v1459_v52 }
 0x71f   :  { %2425 = vmatmul.mubr.f32.gmra.mxu0 %v1460_v19 }
 0x720   :  { %2427 = vmatprep.mubr.f32.mxu0 %v1461_v11 }
 0x723   :  { %2428 = vmatmul.mubr.f32.gmra.mxu0 %v1462_v21  ;;  %v1718_v21 = vld [vmem:[#allocation2 + $0x20] sm:$0xff] }
 0x724   :  { %2430 = vmatprep.mubr.f32.mxu0 %v1463_v1 }
 0x727   :  { %2431 = vmatmul.mubr.f32.gmra.mxu0 %v1464_v0 }
 0x728   :  { %2433 = vmatprep.mubr.f32.mxu0 %v1465_v40 }
 0x72b   :  { %2434 = vmatmul.mubr.f32.gmra.mxu0 %v1466_v10 }
 0x72c   :  { %2436 = vmatprep.mubr.f32.mxu0 %v3704_v60 }
 0x72f   :  { %2437 = vmatmul.mubr.f32.gmra.mxu0 %v3693_v41 }
 0x730   :  { %2439 = vmatprep.mubr.f32.mxu0 %v3685_v9 }
 0x733   :  { %2440 = vmatmul.mubr.f32.gmra.mxu0 %v3674_v61 }
 0x734   :  { %2442 = vmatprep.mubr.f32.mxu0 %v3651_v15 }
 0x737   :  { %2443 = vmatmul.mubr.f32.gmra.mxu0 %v3664_v28 }
 0x7db   :  { %v2423_v39 = vpop.f32.mrf.mxu0 }
 0x7dc   :  { %v1667_v14 = vmax.f32 %v2423_v39, 0.0 }
 0x7dd   :  { %v1587_v57 = vpop.f32.mrf.mxu0 }
 0x7de   :  { %v1683_v47 = vadd.f32 0.0001, %v1667_v14  ;;  %v1666_v17 = vmax.f32 %v1587_v57, 0.0 }
 0x7df   :  { %v2426_v3 = vpop.f32.mrf.mxu0 }
 0x7e0   :  { %2613 = vrsqrt.f32 %v1683_v47  ;;  %v1682_v45 = vadd.f32 0.0001, %v1666_v17  ;;  %v1669_v29 = vmax.f32 %v2426_v3, 0.0  ;;  %v1720_v47 = vld [vmem:[#allocation2 + $0x30] sm:$0xff]  ;;  %v1721_v17 = vld [vmem:[#allocation2 + $0x38] sm:$0xff] }
 0x7e1   :  { %v1597_v60 = vpop.f32.mrf.mxu0 }
 0x7e2   :  { %2615 = vrsqrt.f32 %v1682_v45  ;;  %v1685_v41 = vadd.f32 0.0001, %v1669_v29  ;;  %v1668_v4 = vmax.f32 %v1597_v60, 0.0 }
 0x7e3   :  { %v2429_v9 = vpop.f32.mrf.mxu0 }
 0x7e4   :  { %2617 = vrsqrt.f32 %v1685_v41  ;;  %v1684_v61 = vadd.f32 0.0001, %v1668_v4  ;;  %v1671_v6 = vmax.f32 %v2429_v9, 0.0 }
 0x7e5   :  { %v1607_v15 = vpop.f32.mrf.mxu0 }
 0x7e6   :  { %2619 = vrsqrt.f32 %v1684_v61  ;;  %v1687_v28 = vadd.f32 0.0001, %v1671_v6  ;;  %v1670_v22 = vmax.f32 %v1607_v15, 0.0  ;;  %v1722_v6 = vld [vmem:[#allocation2 + $0x40] sm:$0xff]  ;;  %v1723_v15 = vld [vmem:[#allocation2 + $0x48] sm:$0xff] }
 0x7e7   :  { %v2432_v24 = vpop.f32.mrf.mxu0 }
 0x7e8   :  { %2621 = vrsqrt.f32 %v1687_v28  ;;  %v1686_v48 = vadd.f32 0.0001, %v1670_v22  ;;  %v1673_v43 = vmax.f32 %v2432_v24, 0.0 }
 0x7e9   :  { %v1617_v25 = vpop.f32.mrf.mxu0 }
 0x7ea   :  { %2623 = vrsqrt.f32 %v1686_v48  ;;  %v1689_v63 = vadd.f32 0.0001, %v1673_v43  ;;  %v1672_v20 = vmax.f32 %v1617_v25, 0.0  ;;  %v1724_v25 = vld [vmem:[#allocation2 + $0x50] sm:$0xff] }
 0x7eb   :  { %v2435_v59 = vpop.f32.mrf.mxu0 }
 0x7ec   :  { %2625 = vrsqrt.f32 %v1689_v63  ;;  %v1688_v49 = vadd.f32 0.0001, %v1672_v20  ;;  %v1675_v27 = vmax.f32 %v2435_v59, 0.0  ;;  %v1725_v63 = vld [vmem:[#allocation2 + $0x58] sm:$0xff] }
 0x7ed   :  { %v2614_v32 = vpop.eup %2613  ;;  %v1627_v36 = vpop.f32.mrf.mxu0 }
 0x7ee   :  { %2627 = vrsqrt.f32 %v1688_v49  ;;  %v1691_v33 = vadd.f32 0.0001, %v1675_v27  ;;  %v1674_v35 = vmax.f32 %v1627_v36, 0.0  ;;  %v1731_v8 = vmul.f32 %v2614_v32, %v1715_v2  ;;  %v1726_v32 = vld [vmem:[#allocation2 + $0x60] sm:$0xff]  ;;  %v1727_v36 = vld [vmem:[#allocation2 + $0x68] sm:$0xff] }
 0x7ef   :  { %v2616_v42 = vpop.eup %2615  ;;  %v2438_v38 = vpop.f32.mrf.mxu0 }
 0x7f0   :  { %2629 = vrsqrt.f32 %v1691_v33  ;;  %v1690_v44 = vadd.f32 0.0001, %v1674_v35  ;;  %v1677_v51 = vmax.f32 %v2438_v38, 0.0  ;;  %v1730_v37 = vmul.f32 %v2616_v42, %v1714_v31 }
 0x7f1   :  { %v2618_v50 = vpop.eup %2617  ;;  %v1637_v23 = vpop.f32.mrf.mxu0 }
 0x7f2   :  { %2631 = vrsqrt.f32 %v1690_v44  ;;  %v1693_v30 = vadd.f32 0.0001, %v1677_v51  ;;  %v1676_v13 = vmax.f32 %v1637_v23, 0.0  ;;  %v1746_v18 = vpack.c.bf16 %v1731_v8, %v1730_v37  ;;  %v1728_v8 = vld [vmem:[#allocation2 + $0x70] sm:$0xff]  ;;  %v1729_v44 = vld [vmem:[#allocation2 + $0x78] sm:$0xff] }
 0x7f3   :  { %v2620_v7 = vpop.eup %2619  ;;  %v2441_v58 = vpop.f32.mrf.mxu0  ;;  %v1733_v5 = vmul.f32 %v2618_v50, %v1717_v55 }
 0x7f4   :  { %2633 = vrsqrt.f32 %v1693_v30  ;;  %v1692_v52 = vadd.f32 0.0001, %v1676_v13  ;;  %v1679_v54 = vmax.f32 %v2441_v58, 0.0  ;;  %2461 = vmatprep.mubr.bf16.mxu1 %v1746_v18  ;;  %v1732_v19 = vmul.f32 %v2620_v7, %v1716_v56 }
 0x7f5   :  { %v2622_v11 = vpop.eup %2621  ;;  %v1647_v12 = vpop.f32.mrf.mxu0 }
 0x7f6   :  { %2635 = vrsqrt.f32 %v1692_v52  ;;  %v1695_v26 = vadd.f32 0.0001, %v1679_v54  ;;  %v1678_v1 = vmax.f32 %v1647_v12, 0.0  ;;  %v1747_v62 = vpack.c.bf16 %v1733_v5, %v1732_v19 }
 0x7f7   :  { %v2624_v0 = vpop.eup %2623  ;;  %v2444_v46 = vpop.f32.mrf.mxu0  ;;  %v1735_v40 = vmul.f32 %v2622_v11, %v1719_v53 }
 0x7f8   :  { %2637 = vrsqrt.f32 %v1695_v26  ;;  %v1694_v16 = vadd.f32 0.0001, %v1678_v1  ;;  %v1681_v10 = vmax.f32 %v2444_v46, 0.0  ;;  %2462 = vmatmul.mubr.bf16.vlgmr.msra.gmra.mxu1 %v1747_v62  ;;  %v1734_v39 = vmul.f32 %v2624_v0, %v1718_v21 }
 0x7f9   :  { %v2626_v14 = vpop.eup %2625  ;;  %v1657_v57 = vpop.f32.mrf.mxu0 }
 0x7fa   :  { %2639 = vrsqrt.f32 %v1694_v16  ;;  %v1697_v3 = vadd.f32 0.0001, %v1681_v10  ;;  %v1680_v45 = vmax.f32 %v1657_v57, 0.0  ;;  %v1748_v29 = vpack.c.bf16 %v1735_v40, %v1734_v39 }
 0x7fb   :  { %v2628_v60 = vpop.eup %2627  ;;  %v1737_v9 = vmul.f32 %v2626_v14, %v1721_v17 }
 0x7fc   :  { %2641 = vrsqrt.f32 %v1697_v3  ;;  %v1696_v41 = vadd.f32 0.0001, %v1680_v45  ;;  %2465 = vmatprep.mubr.bf16.mxu1 %v1748_v29  ;;  %v1736_v4 = vmul.f32 %v2628_v60, %v1720_v47 }
 0x7fd   :  { %v2630_v61 = vpop.eup %2629 }
 0x7fe   :  { %2643 = vrsqrt.f32 %v1696_v41  ;;  %v1749_v28 = vpack.c.bf16 %v1737_v9, %v1736_v4  ;;  %v1739_v48 = vmul.f32 %v2630_v61, %v1723_v15 }
 0x7ff   :  { %v2632_v22 = vpop.eup %2631 }
 0x800   :  { %2466 = vmatmul.mubr.bf16.gmra.mxu1 %v1749_v28  ;;  %v1738_v24 = vmul.f32 %v2632_v22, %v1722_v6 }
 0x801   :  { %v2634_v43 = vpop.eup %2633 }
 0x802   :  { %v1750_v20 = vpack.c.bf16 %v1739_v48, %v1738_v24  ;;  %v1741_v27 = vmul.f32 %v2634_v43, %v1725_v63 }
 0x803   :  { %v2636_v59 = vpop.eup %2635 }
 0x804   :  { %2469 = vmatprep.mubr.bf16.mxu1 %v1750_v20  ;;  %v1740_v49 = vmul.f32 %v2636_v59, %v1724_v25 }
 0x805   :  { %v2638_v2 = vpop.eup %2637 }
 0x806   :  { %v1751_v31 = vpack.c.bf16 %v1741_v27, %v1740_v49  ;;  %v1743_v42 = vmul.f32 %v2638_v2, %v1727_v36 }
 0x807   :  { %v2640_v33 = vpop.eup %2639 }
 0x808   :  { %2470 = vmatmul.mubr.bf16.gmra.mxu1 %v1751_v31  ;;  %v1742_v35 = vmul.f32 %v2640_v33, %v1726_v32 }
 0x809   :  { %v2642_v38 = vpop.eup %2641 }
 0x80a   :  { %v1752_v51 = vpack.c.bf16 %v1743_v42, %v1742_v35  ;;  %v1745_v50 = vmul.f32 %v2642_v38, %v1729_v44 }
 0x80b   :  { %v2644_v37 = vpop.eup %2643 }
 0x80c   :  { %2473 = vmatprep.mubr.bf16.mxu1 %v1752_v51  ;;  %v1744_v55 = vmul.f32 %v2644_v37, %v1728_v8 }
 0x80e   :  { %v1753_v23 = vpack.c.bf16 %v1745_v50, %v1744_v55 }
 0x810   :  { %2474 = vmatmul.mubr.bf16.gmra.mxu1 %v1753_v23 }
 0x8b8   :  { %v3840_v56 = vpop.f32.mrf.mxu1 }
 0x8b9   :  { %2645 = vrcp.f32 %v3840_v56 }
 0x8ba   :  { %v3843_v30 = vpop.f32.mrf.mxu1 }
 0x8bb   :  { %2647 = vrcp.f32 %v3843_v30 }
 0x8bc   :  { %v3846_v13 = vpop.f32.mrf.mxu1 }
 0x8bd   :  { %2649 = vrcp.f32 %v3846_v13 }
 0x8be   :  { %v3849_v18 = vpop.f32.mrf.mxu1 }
 0x8bf   :  { %2651 = vrcp.f32 %v3849_v18 }
 0x8c0   :  { %v3852_v7 = vpop.f32.mrf.mxu1 }
 0x8c1   :  { %2653 = vrcp.f32 %v3852_v7 }
 0x8c2   :  { %v3854_v58 = vpop.f32.mrf.mxu1 }
 0x8c4   :  { %v3857_v5 = vpop.f32.mrf.mxu1 }
 0x8c5   :  { %2655 = vrcp.f32 %v3857_v5 }
 0x8c6   :  { %v2646_v52 = vpop.eup %2645  ;;  %v3860_v54 = vpop.f32.mrf.mxu1  ;;  %2657 = vrcp.f32 %v3854_v58 }
 0x8c7   :  { %1887 = vperm.xlu1 %2484, %v2646_v52   ;;  %2659 = vrcp.f32 %v3860_v54 }
 0x8c8   :  { %v2648_v19 = vpop.eup %2647  ;;  %v3863_v53 = vpop.f32.mrf.mxu1 }
 0x8c9   :  { %1877 = vperm.xlu0 %2483, %v2648_v19   ;;  %2661 = vrcp.f32 %v3863_v53 }
 0x8ca   :  { %v3866_v11 = vpop.f32.mrf.mxu1  ;;  %v2650_v12 = vpop.eup %2649 }
 0x8cc   :  { %v2652_v21 = vpop.eup %2651  ;;  %v3869_v26 = vpop.f32.mrf.mxu1 }
 0x8cd   :  { %2663 = vrcp.f32 %v3869_v26  ;;  %1892 = vperm.xlu0 %2483, %v2650_v12   ;;  %1882 = vperm.xlu1 %2484, %v2652_v21  }
 0x8ce   :  { %v3872_v1 = vpop.f32.mrf.mxu1  ;;  %2665 = vrcp.f32 %v3866_v11  ;;  %v2654_v62 = vpop.eup %2653 }
 0x8cf   :  { %2667 = vrcp.f32 %v3872_v1 }
 0x8d0   :  { %v3875_v0 = vpop.f32.mrf.mxu1 }
 0x8d1   :  { %1907 = vperm.xlu1 %2484, %v2654_v62  }
 0x8d2   :  { %v2656_v46 = vpop.eup %2655  ;;  %v3878_v40 = vpop.f32.mrf.mxu1 }
 0x8d3   :  { %2669 = vrcp.f32 %v3878_v40  ;;  %1912 = vperm.xlu0 %2483, %v2656_v46   ;;  %v2658_v16 = vpop.eup %2657 }
 0x8d4   :  { %v3881_v10 = vpop.f32.mrf.mxu1  ;;  %v2660_v39 = vpop.eup %2659  ;;  %2671 = vrcp.f32 %v3875_v0 }
 0x8d5   :  { %1897 = vperm.xlu1 %2484, %v2658_v16  }
 0x8d6   :  { %v3884_v14 = vpop.f32.mrf.mxu1  ;;  %v2662_v57 = vpop.eup %2661 }
 0x8d7   :  { %2673 = vrcp.f32 %v3884_v14  ;;  %1902 = vperm.xlu0 %2483, %v2660_v39  }
 0x8d8   :  { %2675 = vrcp.f32 %v3881_v10 }
 0x8d9   :  { %1927 = vperm.xlu1 %2484, %v2662_v57  }
 0x8da   :  { %v2664_v47 = vpop.eup %2663 }
 0x8db   :  { %1932 = vperm.xlu0 %2483, %v2664_v47   ;;  %v2666_v17 = vpop.eup %2665 }
 0x8dc   :  { %v2668_v3 = vpop.eup %2667 }
 0x8dd   :  { %1917 = vperm.xlu1 %2484, %v2666_v17  }
 0x8df   :  { %1922 = vperm.xlu0 %2483, %v2668_v3  }
 0x8e0   :  { %v2670_v45 = vpop.eup %2669 }
 0x8e1   :  { %1937 = vperm.xlu1 %2484, %v2670_v45   ;;  %v2672_v29 = vpop.eup %2671 }
 0x8e4   :  { %v2674_v60 = vpop.eup %2673 }
 0x8e5   :  { %1947 = vperm.xlu1 %2484, %v2672_v29   ;;  %1942 = vperm.xlu0 %2483, %v2674_v60   ;;  %v2676_v41 = vpop.eup %2675 }
 0x8e9   :  { %1952 = vperm.xlu0 %2483, %v2676_v41  }
 0x942   :  { %v1888_v4 = vpop.permute.xlu1 %1887 }
 0x943   :  { %v1957_v9 = vmul.f32 %v3840_v56, %v1888_v4 }
 0x944   :  { %v1878_v61 = vpop.permute.xlu0 %1877 }
 0x945   :  { %v1973_v6 = vsel %vm75_vm1, 1.0, %v1957_v9  ;;  %v1955_v15 = vmul.f32 %v1878_v61, %v3843_v30 }
 0x946   :  { %1989 = vst [vmem:[#allocation7 + $0x10] sm:$0xff] %v1973_v6 }
 0x947   :  { %v1971_v28 = vsel %vm75_vm1, 1.0, %v1955_v15 }
 0x948   :  { %1987 = vst [vmem:[#allocation7] sm:$0xff] %v1971_v28  ;;  %v1893_v22 = vpop.permute.xlu0 %1892  ;;  %v1883_v24 = vpop.permute.xlu1 %1882 }
 0x949   :  { %v1958_v48 = vmul.f32 %v3846_v13, %v1893_v22  ;;  %v1956_v43 = vmul.f32 %v1883_v24, %v3849_v18 }
 0x94b   :  { %v1974_v25 = vsel %vm75_vm1, 1.0, %v1958_v48  ;;  %v1972_v63 = vsel %vm75_vm1, 1.0, %v1956_v43 }
 0x94c   :  { %1990 = vst [vmem:[#allocation7 + $0x18] sm:$0xff] %v1974_v25  ;;  %1988 = vst [vmem:[#allocation7 + $0x8] sm:$0xff] %v1972_v63  ;;  %v1908_v20 = vpop.permute.xlu1 %1907 }
 0x94d   :  { %v1961_v59 = vmul.f32 %v3852_v7, %v1908_v20 }
 0x94e   :  { %v1913_v49 = vpop.permute.xlu0 %1912 }
 0x94f   :  { %v1977_v27 = vsel %vm75_vm1, 1.0, %v1961_v59  ;;  %v1962_v2 = vmul.f32 %v3857_v5, %v1913_v49 }
 0x950   :  { %1993 = vst [vmem:[#allocation7 + $0x30] sm:$0xff] %v1977_v27  ;;  %v1898_v32 = vpop.permute.xlu1 %1897 }
 0x951   :  { %v1978_v36 = vsel %vm75_vm1, 1.0, %v1962_v2  ;;  %v1959_v31 = vmul.f32 %v1898_v32, %v3854_v58 }
 0x952   :  { %1994 = vst [vmem:[#allocation7 + $0x38] sm:$0xff] %v1978_v36  ;;  %v1903_v33 = vpop.permute.xlu0 %1902 }
 0x953   :  { %v1975_v35 = vsel %vm75_vm1, 1.0, %v1959_v31  ;;  %v1960_v42 = vmul.f32 %v1903_v33, %v3860_v54 }
 0x954   :  { %1991 = vst [vmem:[#allocation7 + $0x20] sm:$0xff] %v1975_v35  ;;  %v1928_v38 = vpop.permute.xlu1 %1927 }
 0x955   :  { %v1976_v8 = vsel %vm75_vm1, 1.0, %v1960_v42  ;;  %v1965_v44 = vmul.f32 %v3863_v53, %v1928_v38 }
 0x956   :  { %1992 = vst [vmem:[#allocation7 + $0x28] sm:$0xff] %v1976_v8  ;;  %v1933_v51 = vpop.permute.xlu0 %1932 }
 0x957   :  { %v1981_v37 = vsel %vm75_vm1, 1.0, %v1965_v44  ;;  %v1966_v55 = vmul.f32 %v3869_v26, %v1933_v51 }
 0x958   :  { %1997 = vst [vmem:[#allocation7 + $0x50] sm:$0xff] %v1981_v37  ;;  %v1918_v50 = vpop.permute.xlu1 %1917 }
 0x959   :  { %v1982_v23 = vsel %vm75_vm1, 1.0, %v1966_v55  ;;  %v1963_v56 = vmul.f32 %v1918_v50, %v3866_v11 }
 0x95a   :  { %1998 = vst [vmem:[#allocation7 + $0x58] sm:$0xff] %v1982_v23  ;;  %v1923_v30 = vpop.permute.xlu0 %1922 }
 0x95b   :  { %v1979_v13 = vsel %vm75_vm1, 1.0, %v1963_v56  ;;  %v1964_v18 = vmul.f32 %v1923_v30, %v3872_v1 }
 0x95c   :  { %1995 = vst [vmem:[#allocation7 + $0x40] sm:$0xff] %v1979_v13  ;;  %v1938_v7 = vpop.permute.xlu1 %1937 }
 0x95d   :  { %v1980_v58 = vsel %vm75_vm1, 1.0, %v1964_v18  ;;  %v1967_v5 = vmul.f32 %v1938_v7, %v3878_v40 }
 0x95e   :  { %1996 = vst [vmem:[#allocation7 + $0x48] sm:$0xff] %v1980_v58 }
 0x95f   :  { %v1983_v52 = vsel %vm75_vm1, 1.0, %v1967_v5 }
 0x960   :  { %1999 = vst [vmem:[#allocation7 + $0x60] sm:$0xff] %v1983_v52  ;;  %v1948_v54 = vpop.permute.xlu1 %1947  ;;  %v1943_v19 = vpop.permute.xlu0 %1942 }
 0x961   :  { %v1969_v53 = vmul.f32 %v3875_v0, %v1948_v54  ;;  %v1968_v11 = vmul.f32 %v1943_v19, %v3884_v14 }
 0x963   :  { %v1985_v12 = vsel %vm75_vm1, 1.0, %v1969_v53  ;;  %v1984_v21 = vsel %vm75_vm1, 1.0, %v1968_v11 }
 0x964   :  { %2001 = vst [vmem:[#allocation7 + $0x70] sm:$0xff] %v1985_v12  ;;  %2000 = vst [vmem:[#allocation7 + $0x68] sm:$0xff] %v1984_v21  ;;  %v1953_v26 = vpop.permute.xlu0 %1952 }
 0x965   :  { %v1970_v1 = vmul.f32 %v3881_v10, %v1953_v26 }
 0x967   :  { %v1986_v62 = vsel %vm75_vm1, 1.0, %v1970_v1 }
 0x968   :  { %2002 = vst [vmem:[#allocation7 + $0x78] sm:$0xff] %v1986_v62 }
 0x969   :  { %2728 = shalt.err (!%p2725_p0)
}
 0x96a   :  { %2014 = dma.vmem_to_hbm [thread:$0]  %s2009_s1, 2048, %s3944_s2, [#allocation4], %s2744_s12, %s2744_s12, %s2745_s13  }
 0x96b   :  { %2741 = dma.done.wait [#allocation4], 2048  }
 0x96c   :  { %2742 = vsyncadd [#allocation4], 4294965248 }
 0x96d   :  { %2018 = vsyncpa [#allocation3], 1 }
 0x96e   :  { %2019 = vsyncpa [#allocation6], 1 }
 0x96f   :  { %2020 = vsyncpa [#allocation4], 1 }

</bundles_post_ra>
